<compile_context>
chip_gen: v7x
topology: tpu7x:2x2x1
jax: 0.10.0
libtpu: 0.0.40
codegen_flags: <defaults>
</compile_context>

<pallas_src>
import functools

import jax
import jax.numpy as jnp
from jax.experimental import pallas as pl
from jax.experimental.pallas import tpu as pltpu

LANE = 128                 # TPU lane width; every feature dim is padded to it
F = 128                    # padded hidden width used by the GCN layers
XW_RESIDENT_BYTES = 16 * 1024 * 1024   # keep agg RHS VMEM-resident below this
VMEM_LIMIT = 32 * 1024 * 1024          # safe scoped-VMEM cap on all generations


def _round_up(x, m):
    return ((x + m - 1) // m) * m


def _pad_to(x, shape):
    return jnp.pad(x, [(0, s - d) for s, d in zip(shape, x.shape)])


def _row_tile(n_pad):
    """Row tile for the 'parallel' node axis (n_pad is a multiple of 128).
    Prefer >= 2 tiles so both v7x TensorCores get work."""
    if n_pad <= 128:
        return n_pad
    if n_pad % 256 == 0 and n_pad >= 512:
        return 256
    return 128


def _k_tile(n_pad):
    """Reduction tile over the adjacency column axis (multiple of 128)."""
    if n_pad <= 256:
        return n_pad
    return 256 if n_pad % 256 == 0 else 128


def _edge_tile(e_pad):
    for c in (1024, 512, 256, 128):
        if e_pad >= c and e_pad % c == 0:
            return c
    return e_pad


# ----------------------------- Pallas kernels -----------------------------

def _preprocess_kernel(x_ref, w1_ref, b1_ref, w2_ref, b2_ref, wc_ref, o_ref):
    # relu(relu(x @ W1 + b1) @ W2 + b2) @ Wc1   (weights already [in, out])
    h = jnp.dot(x_ref[...], w1_ref[...], preferred_element_type=jnp.float32)
    h = jnp.maximum(h + b1_ref[...], 0.0).astype(jnp.bfloat16)
    h = jnp.dot(h, w2_ref[...], preferred_element_type=jnp.float32)
    h = jnp.maximum(h + b2_ref[...], 0.0).astype(jnp.bfloat16)
    o_ref[...] = jnp.dot(h, wc_ref[...],
                         preferred_element_type=jnp.float32).astype(o_ref.dtype)


def preprocess(x_pad, w1, b1, w2, b2, wc):
    # TODO(synk): tile the f_in reduction (extra grid axis + f32 accumulator)
    # when input_dim is large enough that resident W1 + x tiles exceed v7x VMEM.
    n_pad, f_in = x_pad.shape
    row_tile = _row_tile(n_pad)
    return pl.pallas_call(
        _preprocess_kernel,
        out_shape=jax.ShapeDtypeStruct((n_pad, F), jnp.bfloat16),
        grid=(n_pad // row_tile,),
        in_specs=[
            pl.BlockSpec((row_tile, f_in), lambda i: (i, 0)),
            pl.BlockSpec(w1.shape, lambda i: (0, 0)),
            pl.BlockSpec(b1.shape, lambda i: (0, 0)),
            pl.BlockSpec(w2.shape, lambda i: (0, 0)),
            pl.BlockSpec(b2.shape, lambda i: (0, 0)),
            pl.BlockSpec(wc.shape, lambda i: (0, 0)),
        ],
        out_specs=pl.BlockSpec((row_tile, F), lambda i: (i, 0)),
        compiler_params=pltpu.CompilerParams(
            dimension_semantics=("parallel",),
            vmem_limit_bytes=VMEM_LIMIT),
    )(x_pad, w1, b1, w2, b2, wc)


def _gcn_layer_kernel(*refs, use_update, has_next, xw_resident, k_tile):
    """One fused GCN layer:
         acc  = sum_k  adj[i, k] @ xw[k]              (bf16 MXU, f32 acc)
       finalize (last k):
         h    = relu(acc + b)
         h    = h @ Wa + prev @ Wb + bm               (optional 'mlp' update)
         emb  = h                                     (f32 output)
         xwn  = h @ Wnext                             (optional, next layer RHS)
    """
    it = iter(refs)
    adj_ref = next(it)
    xw_ref = next(it)
    b_ref = next(it)
    if use_update:
        prev_ref = next(it)
        wa_ref = next(it)
        wb_ref = next(it)
        bm_ref = next(it)
    if has_next:
        wnext_ref = next(it)
    emb_ref = next(it)
    if has_next:
        xwn_ref = next(it)
    acc_ref = next(it)

    k = pl.program_id(1)

    @pl.when(k == 0)
    def _():
        acc_ref[...] = jnp.zeros_like(acc_ref)

    if xw_resident:
        start = pl.multiple_of(k * k_tile, k_tile)
        xw_blk = xw_ref[pl.ds(start, k_tile), :]
    else:
        xw_blk = xw_ref[...]
    acc_ref[...] += jnp.dot(adj_ref[...], xw_blk,
                            preferred_element_type=jnp.float32)

    @pl.when(k == pl.num_programs(1) - 1)
    def _():
        h = jnp.maximum(acc_ref[...] + b_ref[...], 0.0)
        if use_update:
            h = (jnp.dot(h, wa_ref[...], preferred_element_type=jnp.float32)
                 + jnp.dot(prev_ref[...], wb_ref[...],
                           preferred_element_type=jnp.float32)
                 + bm_ref[...])
        emb_ref[...] = h.astype(emb_ref.dtype)
        if has_next:
            xwn_ref[...] = jnp.dot(h, wnext_ref[...],
                                   preferred_element_type=jnp.float32
                                   ).astype(xwn_ref.dtype)


def gcn_layer(adj_pad, xw, b, *, prev=None, wa=None, wb=None, bm=None,
              wnext=None):
    n_pad = adj_pad.shape[0]
    row_tile = _row_tile(n_pad)
    k_tile = _k_tile(n_pad)
    n_k = n_pad // k_tile
    use_update = prev is not None
    has_next = wnext is not None
    xw_resident = xw.size * xw.dtype.itemsize <= XW_RESIDENT_BYTES

    in_specs = [pl.BlockSpec((row_tile, k_tile), lambda i, k: (i, k))]   # adj
    # Note: pipeline_mode=pl.Buffered(3) on the adj spec is a further tuning
    # knob once HBM-bound; left at the default double-buffer here.
    if xw_resident:
        in_specs.append(pl.BlockSpec((n_pad, F), lambda i, k: (0, 0)))   # once
    else:
        in_specs.append(pl.BlockSpec((k_tile, F), lambda i, k: (k, 0)))
    in_specs.append(pl.BlockSpec((1, F), lambda i, k: (0, 0)))           # bias
    args = [adj_pad, xw, b]

    if use_update:
        in_specs += [pl.BlockSpec((row_tile, F), lambda i, k: (i, 0)),   # prev
                     pl.BlockSpec((F, F), lambda i, k: (0, 0)),          # Wa
                     pl.BlockSpec((F, F), lambda i, k: (0, 0)),          # Wb
                     pl.BlockSpec((1, F), lambda i, k: (0, 0))]          # bm
        args += [prev, wa, wb, bm]
    if has_next:
        in_specs.append(pl.BlockSpec((F, F), lambda i, k: (0, 0)))       # Wnext
        args.append(wnext)

    out_shapes = [jax.ShapeDtypeStruct((n_pad, F), jnp.float32)]         # emb
    out_specs = [pl.BlockSpec((row_tile, F), lambda i, k: (i, 0))]
    if has_next:
        out_shapes.append(jax.ShapeDtypeStruct((n_pad, F), jnp.bfloat16))  # xwn
        out_specs.append(pl.BlockSpec((row_tile, F), lambda i, k: (i, 0)))

    kernel = functools.partial(_gcn_layer_kernel, use_update=use_update,
                               has_next=has_next, xw_resident=xw_resident,
                               k_tile=k_tile)

    flops = 2 * n_pad * n_pad * F
    bytes_acc = (adj_pad.size * adj_pad.dtype.itemsize
                 + xw.size * xw.dtype.itemsize
                 + (1 + int(has_next)) * n_pad * F * 4)

    outs = pl.pallas_call(
        kernel,
        out_shape=out_shapes,
        grid=(n_pad // row_tile, n_k),
        in_specs=in_specs,
        out_specs=out_specs,
        scratch_shapes=[pltpu.VMEM((row_tile, F), jnp.float32)],
        compiler_params=pltpu.CompilerParams(
            dimension_semantics=("parallel", "arbitrary"),
            vmem_limit_bytes=VMEM_LIMIT),
        cost_estimate=pl.CostEstimate(flops=flops, transcendentals=0,
                                      bytes_accessed=bytes_acc),
    )(*args)
    if has_next:
        emb, xwn = outs
        return emb, xwn
    (emb,) = outs
    return emb, None


def _decode_kernel(hs_ref, hd_ref, weff_ref, beff_ref, o_ref):
    # score = sum_d(h_src * h_dst * w_eff) + b_eff   (pure VPU/XLU, f32)
    had = hs_ref[...] * hd_ref[...] * weff_ref[...]
    o_ref[...] = jnp.sum(had, axis=-1, keepdims=True) + beff_ref[0]


def decode(hs_pad, hd_pad, weff, beff):
    e_pad, f = hs_pad.shape
    edge_tile = _edge_tile(e_pad)
    out = pl.pallas_call(
        _decode_kernel,
        out_shape=jax.ShapeDtypeStruct((e_pad, 1), jnp.float32),
        grid=(e_pad // edge_tile,),
        in_specs=[
            pl.BlockSpec((edge_tile, f), lambda i: (i, 0)),
            pl.BlockSpec((edge_tile, f), lambda i: (i, 0)),
            pl.BlockSpec((1, f), lambda i: (0, 0)),
            pl.BlockSpec(memory_space=pltpu.MemorySpace.SMEM),
        ],
        out_specs=pl.BlockSpec((edge_tile, 1), lambda i: (i, 0)),
        compiler_params=pltpu.CompilerParams(dimension_semantics=("parallel",)),
    )(hs_pad, hd_pad, weff, beff)
    return out[:, 0]


# ------------------------------- JAX glue ---------------------------------

def build_norm_adj(edge_index, num_nodes):
    """Dense symmetric GCN normalization: D^-1/2 (A + I) D^-1/2."""
    src, dst = edge_index[0], edge_index[1]
    a = jnp.zeros((num_nodes, num_nodes), jnp.float32)
    a = a.at[dst, src].set(1.0)                       # messages flow src -> dst
    eye = jnp.eye(num_nodes, dtype=jnp.float32)
    a = jnp.where(eye > 0, 1.0, a)                    # add self loops
    deg = jnp.sum(a, axis=1)
    dinv = jnp.where(deg > 0, 1.0 / jnp.sqrt(deg), 0.0)
    return dinv[:, None] * a * dinv[None, :]


def init_params(key, input_dim):
    h1, h2 = 64, 32
    shapes = {
        "pre1_w": (256, input_dim), "pre1_b": (256,),
        "pre2_w": (128, 256),       "pre2_b": (128,),
        "conv1_w": (h1, 128),       "conv1_b": (h1,),
        "conv2_w": (h2, h1),        "conv2_b": (h2,),
        "mlp1_w": (h1, 2 * h1),     "mlp1_b": (h1,),
        "mlp2_w": (h2, 2 * h2),     "mlp2_b": (h2,),
        "post_w": (2, h2),          "post_b": (2,),
    }
    params = {}
    keys = jax.random.split(key, len(shapes))
    for k, (name, shp) in zip(keys, sorted(shapes.items())):
        fan_in = shp[-1] if len(shp) > 1 else shp[0]
        params[name] = (jax.random.normal(k, shp, jnp.float32)
                        / jnp.sqrt(jnp.float32(fan_in)))
    params["tau0"] = jnp.array([0.2], jnp.float32)    # unused for update='mlp'
    return params


def prepare_params(params, input_dim):
    """One-time: transpose PyTorch [out,in] weights to [in,out], pad every
    feature dim to a multiple of 128 lanes, and pick kernel dtypes."""
    f_in_pad = _round_up(input_dim, LANE)
    h1, h2 = 64, 32

    def pad_t(w, in_pad, out_pad, dtype=jnp.float32):
        wt = w.T
        out = jnp.zeros((in_pad, out_pad), jnp.float32).at[
            :wt.shape[0], :wt.shape[1]].set(wt)
        return out.astype(dtype)

    def pad_b(b, out_pad):
        return jnp.zeros((1, out_pad), jnp.float32).at[0, :b.shape[0]].set(b)

    return {
        # preprocess chain runs on the MXU in bf16 (f32 accumulation in-kernel)
        "pre1_w": pad_t(params["pre1_w"], f_in_pad, 256, jnp.bfloat16),
        "pre1_b": pad_b(params["pre1_b"], 256),
        "pre2_w": pad_t(params["pre2_w"], 256, 128, jnp.bfloat16),
        "pre2_b": pad_b(params["pre2_b"], 128),
        "conv1_w": pad_t(params["conv1_w"], 128, LANE, jnp.bfloat16),
        "conv1_b": pad_b(params["conv1_b"], LANE),
        # epilogue weights stay f32 (tiny matmuls, hidden under the adj DMA)
        "conv2_w": pad_t(params["conv2_w"], LANE, LANE),
        "conv2_b": pad_b(params["conv2_b"], LANE),
        "mlp1_wa": pad_t(params["mlp1_w"][:, :h1], LANE, LANE),
        "mlp1_wb": pad_t(params["mlp1_w"][:, h1:], LANE, LANE),
        "mlp1_b": pad_b(params["mlp1_b"], LANE),
        "mlp2_wa": pad_t(params["mlp2_w"][:, :h2], LANE, LANE),
        "mlp2_wb": pad_t(params["mlp2_w"][:, h2:], LANE, LANE),
        "mlp2_b": pad_b(params["mlp2_b"], LANE),
        # decoder: summing the 2 classes folds into one effective weight/bias
        "post_weff": jnp.zeros((1, LANE), jnp.float32).at[0, :h2].set(
            jnp.sum(params["post_w"], axis=0)),
        "post_beff": jnp.sum(params["post_b"]).reshape(1),
    }


@functools.partial(jax.jit,
                   static_argnames=("num_nodes", "num_label_edges", "isnap"))
def roland_lp_forward(pp, x_pad, adj_pad, eli_pad, *, num_nodes,
                      num_label_edges, isnap=0, prev_pad=None):
    """Mirrors ROLANDLP.forward with update='mlp', dropout=0.0 (padded arrays)."""
    # fused: preprocess1 + relu + preprocess2 + relu + conv1 feature transform
    xw1 = preprocess(x_pad, pp["pre1_w"], pp["pre1_b"],
                     pp["pre2_w"], pp["pre2_b"], pp["conv1_w"])
    # layer 1: Ahat aggregation + bias + relu (+ mlp update) + conv2 transform
    if isnap > 0:
        emb1, xw2 = gcn_layer(adj_pad, xw1, pp["conv1_b"],
                              prev=prev_pad[0], wa=pp["mlp1_wa"],
                              wb=pp["mlp1_wb"], bm=pp["mlp1_b"],
                              wnext=pp["conv2_w"])
        emb2, _ = gcn_layer(adj_pad, xw2, pp["conv2_b"],
                            prev=prev_pad[1], wa=pp["mlp2_wa"],
                            wb=pp["mlp2_wb"], bm=pp["mlp2_b"])
    else:
        emb1, xw2 = gcn_layer(adj_pad, xw1, pp["conv1_b"], wnext=pp["conv2_w"])
        emb2, _ = gcn_layer(adj_pad, xw2, pp["conv2_b"])
    # TODO(synk): move the endpoint gather into decode via
    # PrefetchScalarGridSpec (pl.Element row gather) once E gets large.
    # TODO(synk): update='gru' (GRUCell) temporal path not implemented.
    h_src = jnp.take(emb2, eli_pad[0], axis=0)
    h_dst = jnp.take(emb2, eli_pad[1], axis=0)
    scores = decode(h_src, h_dst, pp["post_weff"], pp["post_beff"])
    return (scores[:num_label_edges],
            (emb1[:num_nodes, :64], emb2[:num_nodes, :32]))


def reference_forward(params, x, adj, eli, isnap=0, prev=None):
    """Pure-JAX mirror of the PyTorch module (numerical ground truth)."""
    with jax.default_matmul_precision("highest"):
        def lin(v, w, b):
            return v @ w.T + b
        h = jax.nn.relu(lin(x, params["pre1_w"], params["pre1_b"]))
        h = jax.nn.relu(lin(h, params["pre2_w"], params["pre2_b"]))
        h = jax.nn.relu(adj @ (h @ params["conv1_w"].T) + params["conv1_b"])
        if isnap > 0:
            h = lin(jnp.concatenate([h, prev[0]], axis=1),
                    params["mlp1_w"], params["mlp1_b"])
        e1 = h
        h = jax.nn.relu(adj @ (h @ params["conv2_w"].T) + params["conv2_b"])
        if isnap > 0:
            h = lin(jnp.concatenate([h, prev[1]], axis=1),
                    params["mlp2_w"], params["mlp2_b"])
        e2 = h
        had = h[eli[0]] * h[eli[1]]
        out = lin(had, params["post_w"], params["post_b"])
        return jnp.sum(out, axis=-1), (e1, e2)


# --------------------------------- main ------------------------------------

if __name__ == "__main__":
    key = jax.random.PRNGKey(0)
    num_nodes = 16
    input_dim = 8
    num_edges = 24
    num_label_edges = 8

    k_x, k_e, k_l, k_p, k_prev1, k_prev2 = jax.random.split(key, 6)
    x = jax.random.normal(k_x, (num_nodes, input_dim), jnp.float32)
    edge_index = jax.random.randint(k_e, (2, num_edges), 0, num_nodes)
    edge_label_index = jax.random.randint(k_l, (2, num_label_edges), 0, num_nodes)

    params = init_params(k_p, input_dim)
    pp = prepare_params(params, input_dim)
    adj = build_norm_adj(edge_index, num_nodes)

    # pad once: nodes/edges -> multiple of 128, features -> 128 lanes; the
    # dense adjacency and the input features are stored in bf16 (HBM stream).
    n_pad = _round_up(num_nodes, LANE)
    f_in_pad = _round_up(input_dim, LANE)
    e_pad = _round_up(num_label_edges, LANE)
    x_pad = _pad_to(x, (n_pad, f_in_pad)).astype(jnp.bfloat16)
    adj_pad = _pad_to(adj, (n_pad, n_pad)).astype(jnp.bfloat16)
    eli_pad = _pad_to(edge_label_index, (2, e_pad))

    # snapshot 0 (no temporal update)
    scores0, (e1, e2) = roland_lp_forward(
        pp, x_pad, adj_pad, eli_pad,
        num_nodes=num_nodes, num_label_edges=num_label_edges, isnap=0)
    jax.block_until_ready(scores0)

    # snapshot 1 with previous embeddings -> exercises the fused mlp update
    prev = (jax.random.normal(k_prev1, (num_nodes, 64), jnp.float32),
            jax.random.normal(k_prev2, (num_nodes, 32), jnp.float32))
    prev_pad = (_pad_to(prev[0], (n_pad, LANE)), _pad_to(prev[1], (n_pad, LANE)))
    scores1, (e1b, e2b) = roland_lp_forward(
        pp, x_pad, adj_pad, eli_pad,
        num_nodes=num_nodes, num_label_edges=num_label_edges,
        isnap=1, prev_pad=prev_pad)
    jax.block_until_ready((scores1, e1b, e2b))

    # numerical check against the highest-precision pure-JAX reference
    r0, (re1, re2) = reference_forward(params, x, adj, edge_label_index, isnap=0)
    r1, (re1b, re2b) = reference_forward(params, x, adj, edge_label_index,
                                         isnap=1, prev=prev)
    # tolerance loosened slightly vs. an all-f32 kernel: adjacency and
    # activations are bf16 on the wire (f32 accumulation in VMEM).
    tol = dict(rtol=3e-2, atol=3e-2)
    assert scores0.shape == (num_label_edges,)
    assert scores1.shape == (num_label_edges,)
    assert e1b.shape == (num_nodes, 64) and e2b.shape == (num_nodes, 32)
    assert jnp.allclose(scores0, r0, **tol)
    assert jnp.allclose(e1, re1, **tol) and jnp.allclose(e2, re2, **tol)
    assert jnp.allclose(scores1, r1, **tol)
    assert jnp.allclose(e1b, re1b, **tol) and jnp.allclose(e2b, re2b, **tol)
    print("KERNEL_OK")
</pallas_src>

<mosaic_0001>
module attributes {stable_mosaic.version = 11 : i64} {
  func.func @_gcn_layer_kernel(%arg0: i32, %arg1: i32, %arg2: memref<128x128xbf16, #tpu.memory_space<vmem>>, %arg3: memref<128x128xbf16, #tpu.memory_space<vmem>>, %arg4: memref<1x128xf32, #tpu.memory_space<vmem>>, %arg5: memref<128x128xf32, #tpu.memory_space<vmem>>, %arg6: memref<128x128xf32, #tpu.memory_space<vmem>>, %arg7: memref<128x128xbf16, #tpu.memory_space<vmem>>, %arg8: memref<128x128xf32, #tpu.memory_space<vmem>>) attributes {dimension_semantics = [#tpu.dimension_semantics<parallel>, #tpu.dimension_semantics<arbitrary>], iteration_bounds = array<i64: 1, 1>, scalar_prefetch = 0 : i64, scratch_operands = 1 : i64, tpu.core_type = #tpu.core_type<tc>, window_params = [{transform_indices = @transform_0, window_bounds = array<i64: 128, 128>}, {pipeline_mode = #tpu.pipeline_mode<synchronous>, transform_indices = @transform_1, window_bounds = array<i64: 128, 128>}, {pipeline_mode = #tpu.pipeline_mode<synchronous>, transform_indices = @transform_2, window_bounds = array<i64: 1, 128>}, {pipeline_mode = #tpu.pipeline_mode<synchronous>, transform_indices = @transform_3, window_bounds = array<i64: 128, 128>}, {transform_indices = @transform_4, window_bounds = array<i64: 128, 128>}, {transform_indices = @transform_5, window_bounds = array<i64: 128, 128>}]} {
    %c0_i32 = arith.constant 0 : i32
    %0 = arith.cmpi eq, %arg1, %c0_i32 : i32
    %1 = arith.extui %0 : i1 to i32
    %c0_i32_0 = arith.constant 0 : i32
    %2 = arith.cmpi ne, %1, %c0_i32_0 : i32
    scf.if %2 {
      %cst_9 = arith.constant 0.000000e+00 : f32
      %15 = vector.broadcast %cst_9 : f32 to vector<128x128xf32>
      %c0_10 = arith.constant 0 : index
      %c0_11 = arith.constant 0 : index
      %16 = vector.load %arg8[%c0_10, %c0_11] : memref<128x128xf32, #tpu.memory_space<vmem>>, vector<128x128xf32>
      tpu.vector_store %arg8[%c0_10, %c0_11], %15 {strides = array<i32>} : memref<128x128xf32, #tpu.memory_space<vmem>>, vector<128x128xf32>,
    } else {
    }
    %c128_i32 = arith.constant 128 : i32
    %3 = arith.muli %arg1, %c128_i32 : i32
    %4 = tpu.assume_multiple %3, 128 : i32
    %5 = arith.index_cast %4 : i32 to index
    %c0 = arith.constant 0 : index
    %6 = vector.load %arg3[%5, %c0] : memref<128x128xbf16, #tpu.memory_space<vmem>>, vector<128x128xbf16>
    %c0_1 = arith.constant 0 : index
    %c0_2 = arith.constant 0 : index
    %7 = vector.load %arg8[%c0_1, %c0_2] : memref<128x128xf32, #tpu.memory_space<vmem>>, vector<128x128xf32>
    %c0_3 = arith.constant 0 : index
    %c0_4 = arith.constant 0 : index
    %8 = vector.load %arg2[%c0_3, %c0_4] : memref<128x128xbf16, #tpu.memory_space<vmem>>, vector<128x128xbf16>
    %cst = arith.constant dense<0.000000e+00> : vector<128x128xf32>
    %9 = tpu.matmul %8, %6, %cst {dimension_numbers = #tpu.dot_dimension_numbers<[1], [0], [0], [1], [0, 0, 1, 1], [], []>} : vector<128x128xbf16>, vector<128x128xbf16>, vector<128x128xf32> -> vector<128x128xf32>
    %10 = arith.addf %7, %9 : vector<128x128xf32>
    %c0_5 = arith.constant 0 : index
    %c0_6 = arith.constant 0 : index
    %11 = vector.load %arg8[%c0_5, %c0_6] : memref<128x128xf32, #tpu.memory_space<vmem>>, vector<128x128xf32>
    tpu.vector_store %arg8[%c0_5, %c0_6], %10 {strides = array<i32>} : memref<128x128xf32, #tpu.memory_space<vmem>>, vector<128x128xf32>,
    %c0_i32_7 = arith.constant 0 : i32
    %12 = arith.cmpi eq, %arg1, %c0_i32_7 : i32
    %13 = arith.extui %12 : i1 to i32
    %c0_i32_8 = arith.constant 0 : i32
    %14 = arith.cmpi ne, %13, %c0_i32_8 : i32
    scf.if %14 {
      %c0_9 = arith.constant 0 : index
      %c0_10 = arith.constant 0 : index
      %15 = vector.load %arg8[%c0_9, %c0_10] : memref<128x128xf32, #tpu.memory_space<vmem>>, vector<128x128xf32>
      %c0_11 = arith.constant 0 : index
      %c0_12 = arith.constant 0 : index
      %16 = vector.load %arg4[%c0_11, %c0_12] : memref<1x128xf32, #tpu.memory_space<vmem>>, vector<1x128xf32>
      %17 = vector.broadcast %16 : vector<1x128xf32> to vector<128x128xf32>
      %18 = arith.addf %15, %17 : vector<128x128xf32>
      %cst_13 = arith.constant 0.000000e+00 : f32
      %19 = vector.broadcast %cst_13 : f32 to vector<128x128xf32>
      %20 = arith.maximumf %18, %19 : vector<128x128xf32>
      %c0_14 = arith.constant 0 : index
      %c0_15 = arith.constant 0 : index
      %21 = vector.load %arg6[%c0_14, %c0_15] : memref<128x128xf32, #tpu.memory_space<vmem>>, vector<128x128xf32>
      tpu.vector_store %arg6[%c0_14, %c0_15], %20 {strides = array<i32>} : memref<128x128xf32, #tpu.memory_space<vmem>>, vector<128x128xf32>,
      %c0_16 = arith.constant 0 : index
      %c0_17 = arith.constant 0 : index
      %22 = vector.load %arg5[%c0_16, %c0_17] : memref<128x128xf32, #tpu.memory_space<vmem>>, vector<128x128xf32>
      %cst_18 = arith.constant dense<0.000000e+00> : vector<128x128xf32>
      %23 = tpu.matmul %20, %22, %cst_18 {dimension_numbers = #tpu.dot_dimension_numbers<[1], [0], [0], [1], [0, 0, 1, 1], [], []>} : vector<128x128xf32>, vector<128x128xf32>, vector<128x128xf32> -> vector<128x128xf32>
      %24 = arith.truncf %23 : vector<128x128xf32> to vector<128x128xbf16>
      %c0_19 = arith.constant 0 : index
      %c0_20 = arith.constant 0 : index
      %25 = vector.load %arg7[%c0_19, %c0_20] : memref<128x128xbf16, #tpu.memory_space<vmem>>, vector<128x128xbf16>
      tpu.vector_store %arg7[%c0_19, %c0_20], %24 {strides = array<i32>} : memref<128x128xbf16, #tpu.memory_space<vmem>>, vector<128x128xbf16>,
    } else {
    }
    return
  }
  func.func @transform_0(%arg0: i32, %arg1: i32) -> (i32, i32) {
    %c0_i32 = arith.constant 0 : i32
    return %arg0, %arg1 : i32, i32
  }
  func.func @transform_1(%arg0: i32, %arg1: i32) -> (i32, i32) {
    %c0_i32 = arith.constant 0 : i32
    %c0_i32_0 = arith.constant 0 : i32
    %c0_i32_1 = arith.constant 0 : i32
    return %c0_i32, %c0_i32_0 : i32, i32
  }
  func.func @transform_2(%arg0: i32, %arg1: i32) -> (i32, i32) {
    %c0_i32 = arith.constant 0 : i32
    %c0_i32_0 = arith.constant 0 : i32
    %c0_i32_1 = arith.constant 0 : i32
    return %c0_i32, %c0_i32_0 : i32, i32
  }
  func.func @transform_3(%arg0: i32, %arg1: i32) -> (i32, i32) {
    %c0_i32 = arith.constant 0 : i32
    %c0_i32_0 = arith.constant 0 : i32
    %c0_i32_1 = arith.constant 0 : i32
    return %c0_i32, %c0_i32_0 : i32, i32
  }
  func.func @transform_4(%arg0: i32, %arg1: i32) -> (i32, i32) {
    %c0_i32 = arith.constant 0 : i32
    %c0_i32_0 = arith.constant 0 : i32
    return %arg0, %c0_i32 : i32, i32
  }
  func.func @transform_5(%arg0: i32, %arg1: i32) -> (i32, i32) {
    %c0_i32 = arith.constant 0 : i32
    %c0_i32_0 = arith.constant 0 : i32
    return %arg0, %c0_i32 : i32, i32
  }
}

module attributes {stable_mosaic.version = 11 : i64} {
  func.func @_preprocess_kernel(%arg0: i32, %arg1: memref<128x128xbf16, #tpu.memory_space<vmem>>, %arg2: memref<128x256xbf16, #tpu.memory_space<vmem>>, %arg3: memref<1x256xf32, #tpu.memory_space<vmem>>, %arg4: memref<256x128xbf16, #tpu.memory_space<vmem>>, %arg5: memref<1x128xf32, #tpu.memory_space<vmem>>, %arg6: memref<128x128xbf16, #tpu.memory_space<vmem>>, %arg7: memref<128x128xbf16, #tpu.memory_space<vmem>>) attributes {dimension_semantics = [#tpu.dimension_semantics<parallel>], iteration_bounds = array<i64: 1>, scalar_prefetch = 0 : i64, scratch_operands = 0 : i64, tpu.core_type = #tpu.core_type<tc>, window_params = [{transform_indices = @transform_0, window_bounds = array<i64: 128, 128>}, {pipeline_mode = #tpu.pipeline_mode<synchronous>, transform_indices = @transform_1, window_bounds = array<i64: 128, 256>}, {pipeline_mode = #tpu.pipeline_mode<synchronous>, transform_indices = @transform_2, window_bounds = array<i64: 1, 256>}, {pipeline_mode = #tpu.pipeline_mode<synchronous>, transform_indices = @transform_3, window_bounds = array<i64: 256, 128>}, {pipeline_mode = #tpu.pipeline_mode<synchronous>, transform_indices = @transform_4, window_bounds = array<i64: 1, 128>}, {pipeline_mode = #tpu.pipeline_mode<synchronous>, transform_indices = @transform_5, window_bounds = array<i64: 128, 128>}, {transform_indices = @transform_6, window_bounds = array<i64: 128, 128>}]} {
    %c0 = arith.constant 0 : index
    %c0_0 = arith.constant 0 : index
    %0 = vector.load %arg1[%c0, %c0_0] : memref<128x128xbf16, #tpu.memory_space<vmem>>, vector<128x128xbf16>
    %c0_1 = arith.constant 0 : index
    %c0_2 = arith.constant 0 : index
    %1 = vector.load %arg2[%c0_1, %c0_2] : memref<128x256xbf16, #tpu.memory_space<vmem>>, vector<128x256xbf16>
    %cst = arith.constant dense<0.000000e+00> : vector<128x256xf32>
    %2 = tpu.matmul %0, %1, %cst {dimension_numbers = #tpu.dot_dimension_numbers<[1], [0], [0], [1], [0, 0, 1, 1], [], []>} : vector<128x128xbf16>, vector<128x256xbf16>, vector<128x256xf32> -> vector<128x256xf32>
    %c0_3 = arith.constant 0 : index
    %c0_4 = arith.constant 0 : index
    %3 = vector.load %arg3[%c0_3, %c0_4] : memref<1x256xf32, #tpu.memory_space<vmem>>, vector<1x256xf32>
    %4 = vector.broadcast %3 : vector<1x256xf32> to vector<128x256xf32>
    %5 = arith.addf %2, %4 : vector<128x256xf32>
    %cst_5 = arith.constant 0.000000e+00 : f32
    %6 = vector.broadcast %cst_5 : f32 to vector<128x256xf32>
    %7 = arith.maximumf %5, %6 : vector<128x256xf32>
    %8 = arith.truncf %7 : vector<128x256xf32> to vector<128x256xbf16>
    %c0_6 = arith.constant 0 : index
    %c0_7 = arith.constant 0 : index
    %9 = vector.load %arg4[%c0_6, %c0_7] : memref<256x128xbf16, #tpu.memory_space<vmem>>, vector<256x128xbf16>
    %cst_8 = arith.constant dense<0.000000e+00> : vector<128x128xf32>
    %10 = tpu.matmul %8, %9, %cst_8 {dimension_numbers = #tpu.dot_dimension_numbers<[1], [0], [0], [1], [0, 0, 1, 1], [], []>} : vector<128x256xbf16>, vector<256x128xbf16>, vector<128x128xf32> -> vector<128x128xf32>
    %c0_9 = arith.constant 0 : index
    %c0_10 = arith.constant 0 : index
    %11 = vector.load %arg5[%c0_9, %c0_10] : memref<1x128xf32, #tpu.memory_space<vmem>>, vector<1x128xf32>
    %12 = vector.broadcast %11 : vector<1x128xf32> to vector<128x128xf32>
    %13 = arith.addf %10, %12 : vector<128x128xf32>
    %cst_11 = arith.constant 0.000000e+00 : f32
    %14 = vector.broadcast %cst_11 : f32 to vector<128x128xf32>
    %15 = arith.maximumf %13, %14 : vector<128x128xf32>
    %16 = arith.truncf %15 : vector<128x128xf32> to vector<128x128xbf16>
    %c0_12 = arith.constant 0 : index
    %c0_13 = arith.constant 0 : index
    %17 = vector.load %arg6[%c0_12, %c0_13] : memref<128x128xbf16, #tpu.memory_space<vmem>>, vector<128x128xbf16>
    %cst_14 = arith.constant dense<0.000000e+00> : vector<128x128xf32>
    %18 = tpu.matmul %16, %17, %cst_14 {dimension_numbers = #tpu.dot_dimension_numbers<[1], [0], [0], [1], [0, 0, 1, 1], [], []>} : vector<128x128xbf16>, vector<128x128xbf16>, vector<128x128xf32> -> vector<128x128xf32>
    %19 = arith.truncf %18 : vector<128x128xf32> to vector<128x128xbf16>
    %c0_15 = arith.constant 0 : index
    %c0_16 = arith.constant 0 : index
    %20 = vector.load %arg7[%c0_15, %c0_16] : memref<128x128xbf16, #tpu.memory_space<vmem>>, vector<128x128xbf16>
    tpu.vector_store %arg7[%c0_15, %c0_16], %19 {strides = array<i32>} : memref<128x128xbf16, #tpu.memory_space<vmem>>, vector<128x128xbf16>,
    return
  }
  func.func @transform_0(%arg0: i32) -> (i32, i32) {
    %c0_i32 = arith.constant 0 : i32
    %c0_i32_0 = arith.constant 0 : i32
    return %arg0, %c0_i32 : i32, i32
  }
  func.func @transform_1(%arg0: i32) -> (i32, i32) {
    %c0_i32 = arith.constant 0 : i32
    %c0_i32_0 = arith.constant 0 : i32
    %c0_i32_1 = arith.constant 0 : i32
    return %c0_i32, %c0_i32_0 : i32, i32
  }
  func.func @transform_2(%arg0: i32) -> (i32, i32) {
    %c0_i32 = arith.constant 0 : i32
    %c0_i32_0 = arith.constant 0 : i32
    %c0_i32_1 = arith.constant 0 : i32
    return %c0_i32, %c0_i32_0 : i32, i32
  }
  func.func @transform_3(%arg0: i32) -> (i32, i32) {
    %c0_i32 = arith.constant 0 : i32
    %c0_i32_0 = arith.constant 0 : i32
    %c0_i32_1 = arith.constant 0 : i32
    return %c0_i32, %c0_i32_0 : i32, i32
  }
  func.func @transform_4(%arg0: i32) -> (i32, i32) {
    %c0_i32 = arith.constant 0 : i32
    %c0_i32_0 = arith.constant 0 : i32
    %c0_i32_1 = arith.constant 0 : i32
    return %c0_i32, %c0_i32_0 : i32, i32
  }
  func.func @transform_5(%arg0: i32) -> (i32, i32) {
    %c0_i32 = arith.constant 0 : i32
    %c0_i32_0 = arith.constant 0 : i32
    %c0_i32_1 = arith.constant 0 : i32
    return %c0_i32, %c0_i32_0 : i32, i32
  }
  func.func @transform_6(%arg0: i32) -> (i32, i32) {
    %c0_i32 = arith.constant 0 : i32
    %c0_i32_0 = arith.constant 0 : i32
    return %arg0, %c0_i32 : i32, i32
  }
}

module attributes {stable_mosaic.version = 11 : i64} {
  func.func @_gcn_layer_kernel(%arg0: i32, %arg1: i32, %arg2: memref<128x128xbf16, #tpu.memory_space<vmem>>, %arg3: memref<128x128xbf16, #tpu.memory_space<vmem>>, %arg4: memref<1x128xf32, #tpu.memory_space<vmem>>, %arg5: memref<128x128xf32, #tpu.memory_space<vmem>>, %arg6: memref<128x128xf32, #tpu.memory_space<vmem>>) attributes {dimension_semantics = [#tpu.dimension_semantics<parallel>, #tpu.dimension_semantics<arbitrary>], iteration_bounds = array<i64: 1, 1>, scalar_prefetch = 0 : i64, scratch_operands = 1 : i64, tpu.core_type = #tpu.core_type<tc>, window_params = [{transform_indices = @transform_0, window_bounds = array<i64: 128, 128>}, {pipeline_mode = #tpu.pipeline_mode<synchronous>, transform_indices = @transform_1, window_bounds = array<i64: 128, 128>}, {pipeline_mode = #tpu.pipeline_mode<synchronous>, transform_indices = @transform_2, window_bounds = array<i64: 1, 128>}, {transform_indices = @transform_3, window_bounds = array<i64: 128, 128>}]} {
    %c0_i32 = arith.constant 0 : i32
    %0 = arith.cmpi eq, %arg1, %c0_i32 : i32
    %1 = arith.extui %0 : i1 to i32
    %c0_i32_0 = arith.constant 0 : i32
    %2 = arith.cmpi ne, %1, %c0_i32_0 : i32
    scf.if %2 {
      %cst_9 = arith.constant 0.000000e+00 : f32
      %15 = vector.broadcast %cst_9 : f32 to vector<128x128xf32>
      %c0_10 = arith.constant 0 : index
      %c0_11 = arith.constant 0 : index
      %16 = vector.load %arg6[%c0_10, %c0_11] : memref<128x128xf32, #tpu.memory_space<vmem>>, vector<128x128xf32>
      tpu.vector_store %arg6[%c0_10, %c0_11], %15 {strides = array<i32>} : memref<128x128xf32, #tpu.memory_space<vmem>>, vector<128x128xf32>,
    } else {
    }
    %c128_i32 = arith.constant 128 : i32
    %3 = arith.muli %arg1, %c128_i32 : i32
    %4 = tpu.assume_multiple %3, 128 : i32
    %5 = arith.index_cast %4 : i32 to index
    %c0 = arith.constant 0 : index
    %6 = vector.load %arg3[%5, %c0] : memref<128x128xbf16, #tpu.memory_space<vmem>>, vector<128x128xbf16>
    %c0_1 = arith.constant 0 : index
    %c0_2 = arith.constant 0 : index
    %7 = vector.load %arg6[%c0_1, %c0_2] : memref<128x128xf32, #tpu.memory_space<vmem>>, vector<128x128xf32>
    %c0_3 = arith.constant 0 : index
    %c0_4 = arith.constant 0 : index
    %8 = vector.load %arg2[%c0_3, %c0_4] : memref<128x128xbf16, #tpu.memory_space<vmem>>, vector<128x128xbf16>
    %cst = arith.constant dense<0.000000e+00> : vector<128x128xf32>
    %9 = tpu.matmul %8, %6, %cst {dimension_numbers = #tpu.dot_dimension_numbers<[1], [0], [0], [1], [0, 0, 1, 1], [], []>} : vector<128x128xbf16>, vector<128x128xbf16>, vector<128x128xf32> -> vector<128x128xf32>
    %10 = arith.addf %7, %9 : vector<128x128xf32>
    %c0_5 = arith.constant 0 : index
    %c0_6 = arith.constant 0 : index
    %11 = vector.load %arg6[%c0_5, %c0_6] : memref<128x128xf32, #tpu.memory_space<vmem>>, vector<128x128xf32>
    tpu.vector_store %arg6[%c0_5, %c0_6], %10 {strides = array<i32>} : memref<128x128xf32, #tpu.memory_space<vmem>>, vector<128x128xf32>,
    %c0_i32_7 = arith.constant 0 : i32
    %12 = arith.cmpi eq, %arg1, %c0_i32_7 : i32
    %13 = arith.extui %12 : i1 to i32
    %c0_i32_8 = arith.constant 0 : i32
    %14 = arith.cmpi ne, %13, %c0_i32_8 : i32
    scf.if %14 {
      %c0_9 = arith.constant 0 : index
      %c0_10 = arith.constant 0 : index
      %15 = vector.load %arg6[%c0_9, %c0_10] : memref<128x128xf32, #tpu.memory_space<vmem>>, vector<128x128xf32>
      %c0_11 = arith.constant 0 : index
      %c0_12 = arith.constant 0 : index
      %16 = vector.load %arg4[%c0_11, %c0_12] : memref<1x128xf32, #tpu.memory_space<vmem>>, vector<1x128xf32>
      %17 = vector.broadcast %16 : vector<1x128xf32> to vector<128x128xf32>
      %18 = arith.addf %15, %17 : vector<128x128xf32>
      %cst_13 = arith.constant 0.000000e+00 : f32
      %19 = vector.broadcast %cst_13 : f32 to vector<128x128xf32>
      %20 = arith.maximumf %18, %19 : vector<128x128xf32>
      %c0_14 = arith.constant 0 : index
      %c0_15 = arith.constant 0 : index
      %21 = vector.load %arg5[%c0_14, %c0_15] : memref<128x128xf32, #tpu.memory_space<vmem>>, vector<128x128xf32>
      tpu.vector_store %arg5[%c0_14, %c0_15], %20 {strides = array<i32>} : memref<128x128xf32, #tpu.memory_space<vmem>>, vector<128x128xf32>,
    } else {
    }
    return
  }
  func.func @transform_0(%arg0: i32, %arg1: i32) -> (i32, i32) {
    %c0_i32 = arith.constant 0 : i32
    return %arg0, %arg1 : i32, i32
  }
  func.func @transform_1(%arg0: i32, %arg1: i32) -> (i32, i32) {
    %c0_i32 = arith.constant 0 : i32
    %c0_i32_0 = arith.constant 0 : i32
    %c0_i32_1 = arith.constant 0 : i32
    return %c0_i32, %c0_i32_0 : i32, i32
  }
  func.func @transform_2(%arg0: i32, %arg1: i32) -> (i32, i32) {
    %c0_i32 = arith.constant 0 : i32
    %c0_i32_0 = arith.constant 0 : i32
    %c0_i32_1 = arith.constant 0 : i32
    return %c0_i32, %c0_i32_0 : i32, i32
  }
  func.func @transform_3(%arg0: i32, %arg1: i32) -> (i32, i32) {
    %c0_i32 = arith.constant 0 : i32
    %c0_i32_0 = arith.constant 0 : i32
    return %arg0, %c0_i32 : i32, i32
  }
}

module attributes {stable_mosaic.version = 11 : i64} {
  func.func @_decode_kernel(%arg0: i32, %arg1: memref<128x128xf32, #tpu.memory_space<vmem>>, %arg2: memref<128x128xf32, #tpu.memory_space<vmem>>, %arg3: memref<1x128xf32, #tpu.memory_space<vmem>>, %arg4: memref<1xf32, #tpu.memory_space<smem>>, %arg5: memref<128x1xf32, #tpu.memory_space<vmem>>) attributes {dimension_semantics = [#tpu.dimension_semantics<parallel>], iteration_bounds = array<i64: 1>, scalar_prefetch = 0 : i64, scratch_operands = 0 : i64, tpu.core_type = #tpu.core_type<tc>, window_params = [{transform_indices = @transform_0, window_bounds = array<i64: 128, 128>}, {transform_indices = @transform_1, window_bounds = array<i64: 128, 128>}, {pipeline_mode = #tpu.pipeline_mode<synchronous>, transform_indices = @transform_2, window_bounds = array<i64: 1, 128>}, {transform_indices = @transform_3, window_bounds = array<i64: 1>}, {transform_indices = @transform_4, window_bounds = array<i64: 128, 1>}]} {
    %c0 = arith.constant 0 : index
    %c0_0 = arith.constant 0 : index
    %0 = vector.load %arg1[%c0, %c0_0] : memref<128x128xf32, #tpu.memory_space<vmem>>, vector<128x128xf32>
    %c0_1 = arith.constant 0 : index
    %c0_2 = arith.constant 0 : index
    %1 = vector.load %arg2[%c0_1, %c0_2] : memref<128x128xf32, #tpu.memory_space<vmem>>, vector<128x128xf32>
    %2 = arith.mulf %0, %1 : vector<128x128xf32>
    %c0_3 = arith.constant 0 : index
    %c0_4 = arith.constant 0 : index
    %3 = vector.load %arg3[%c0_3, %c0_4] : memref<1x128xf32, #tpu.memory_space<vmem>>, vector<1x128xf32>
    %4 = vector.broadcast %3 : vector<1x128xf32> to vector<128x128xf32>
    %5 = arith.mulf %2, %4 : vector<128x128xf32>
    %cst = arith.constant dense<0.000000e+00> : vector<128xf32>
    %6 = vector.multi_reduction <add>, %5, %cst [1] : vector<128x128xf32> to vector<128xf32>
    %7 = vector.shape_cast %6 : vector<128xf32> to vector<128x1xf32>
    %c0_5 = arith.constant 0 : index
    %8 = memref.load %arg4[%c0_5] : memref<1xf32, #tpu.memory_space<smem>>
    %9 = vector.broadcast %8 : f32 to vector<128x1xf32>
    %10 = arith.addf %7, %9 : vector<128x1xf32>
    %c0_6 = arith.constant 0 : index
    %c0_7 = arith.constant 0 : index
    %11 = vector.load %arg5[%c0_6, %c0_7] : memref<128x1xf32, #tpu.memory_space<vmem>>, vector<128x1xf32>
    tpu.vector_store %arg5[%c0_6, %c0_7], %10 {strides = array<i32>} : memref<128x1xf32, #tpu.memory_space<vmem>>, vector<128x1xf32>,
    return
  }
  func.func @transform_0(%arg0: i32) -> (i32, i32) {
    %c0_i32 = arith.constant 0 : i32
    %c0_i32_0 = arith.constant 0 : i32
    return %arg0, %c0_i32 : i32, i32
  }
  func.func @transform_1(%arg0: i32) -> (i32, i32) {
    %c0_i32 = arith.constant 0 : i32
    %c0_i32_0 = arith.constant 0 : i32
    return %arg0, %c0_i32 : i32, i32
  }
  func.func @transform_2(%arg0: i32) -> (i32, i32) {
    %c0_i32 = arith.constant 0 : i32
    %c0_i32_0 = arith.constant 0 : i32
    %c0_i32_1 = arith.constant 0 : i32
    return %c0_i32, %c0_i32_0 : i32, i32
  }
  func.func @transform_3(%arg0: i32) -> i32 {
    %c0_i32 = arith.constant 0 : i32
    %c0_i32_0 = arith.constant 0 : i32
    return %c0_i32 : i32
  }
  func.func @transform_4(%arg0: i32) -> (i32, i32) {
    %c0_i32 = arith.constant 0 : i32
    %c0_i32_0 = arith.constant 0 : i32
    return %arg0, %c0_i32 : i32, i32
  }
}

</mosaic_0001>

<bundles_post_ra>
// kernel: roland_lp_forward.6
= control target key start
LH: loop header
LB: loop body
LE: loop exit
PB: predicated region body
PF: predicated region fallthrough
CT: control target
= control target key end

     0   :  { %s609_s1 = inlined_call_operand.vmem [shape: bf16[128,128], index: 1, kind: input, shape index: {}]   ;;  %s610_s0 = inlined_call_operand.vmem [shape: bf16[128,128], index: 0, kind: input, shape index: {}]   ;;  %s611_s2 = inlined_call_operand.vmem [shape: f32[1,128], index: 2, kind: input, shape index: {}]   ;;  %s612_s3 = inlined_call_operand.vmem [shape: f32[128,128], index: 3, kind: output, shape index: {}]  }
   0x1   :  { %v474_v0 = vld [vmem:[%s609_s1] sm:$0xff]   ;;  %v475_v1 = vld [vmem:[%s609_s1 + $0x8] sm:$0xff]   ;;  %v476_v2 = vld [vmem:[%s609_s1 + $0x10] sm:$0xff]  }
   0x2   :  { %426 = vmatprep.subr.bf16.mxu0 %v474_v0  ;;  %458 = vmatprep.subr.bf16.mxu1 %v474_v0  ;;  %v477_v3 = vld [vmem:[%s609_s1 + $0x18] sm:$0xff]   ;;  %v482_v4 = vld [vmem:[%s610_s0] sm:$0xff]   ;;  %v479_v7 = vld [vmem:[%s609_s1 + $0x28] sm:$0xff]  }
   0x3   :  { %427 = vmatpush3.bf16.msra.mxu0 %v474_v0  ;;  %466 = vmatpush3.bf16.msra.mxu1 %v474_v0  ;;  %v483_v5 = vld [vmem:[%s610_s0 + $0x20] sm:$0xff]   ;;  %v480_v8 = vld [vmem:[%s609_s1 + $0x30] sm:$0xff]   ;;  %v481_v9 = vld [vmem:[%s609_s1 + $0x38] sm:$0xff]  }
   0x4   :  { %428 = vmatprep.subr.bf16.mxu0 %v475_v1  ;;  %459 = vmatprep.subr.bf16.mxu1 %v475_v1  ;;  %v478_v6 = vld [vmem:[%s609_s1 + $0x20] sm:$0xff]   ;;  %v484_v10 = vld [vmem:[%s610_s0 + $0x8] sm:$0xff]   ;;  %v486_v12 = vld [vmem:[%s610_s0 + $0x10] sm:$0xff]  }
   0x5   :  { %442 = vmatprep.mubr.bf16.mxu0 %v482_v4  ;;  %450 = vmatprep.mubr.bf16.mxu1 %v483_v5  ;;  %v485_v11 = vld [vmem:[%s610_s0 + $0x28] sm:$0xff]   ;;  %v487_v13 = vld [vmem:[%s610_s0 + $0x30] sm:$0xff]   ;;  %v488_v14 = vld [vmem:[%s610_s0 + $0x18] sm:$0xff]  }
   0x6   :  { %v489_v15 = vld [vmem:[%s610_s0 + $0x38] sm:$0xff]   ;;  %v409_v16 = vld [vmem:[%s611_s2] ss:$0 sm:$0xff] }
   0x7   :  { %429 = vmatpush3.bf16.msra.mxu0 %v475_v1  ;;  %467 = vmatpush3.bf16.msra.mxu1 %v475_v1 }
   0x8   :  { %430 = vmatprep.subr.bf16.mxu0 %v476_v2  ;;  %460 = vmatprep.subr.bf16.mxu1 %v476_v2 }
   0xb   :  { %431 = vmatpush3.bf16.msra.mxu0 %v476_v2  ;;  %468 = vmatpush3.bf16.msra.mxu1 %v476_v2 }
   0xc   :  { %432 = vmatprep.subr.bf16.mxu0 %v477_v3  ;;  %461 = vmatprep.subr.bf16.mxu1 %v477_v3 }
   0xf   :  { %433 = vmatpush3.bf16.msra.mxu0 %v477_v3  ;;  %469 = vmatpush3.bf16.msra.mxu1 %v477_v3 }
  0x10   :  { %434 = vmatprep.subr.bf16.mxu0 %v478_v6  ;;  %462 = vmatprep.subr.bf16.mxu1 %v478_v6 }
  0x13   :  { %435 = vmatpush3.bf16.msra.mxu0 %v478_v6  ;;  %470 = vmatpush3.bf16.msra.mxu1 %v478_v6 }
  0x14   :  { %436 = vmatprep.subr.bf16.mxu0 %v479_v7  ;;  %463 = vmatprep.subr.bf16.mxu1 %v479_v7 }
  0x17   :  { %437 = vmatpush3.bf16.msra.mxu0 %v479_v7  ;;  %471 = vmatpush3.bf16.msra.mxu1 %v479_v7 }
  0x18   :  { %438 = vmatprep.subr.bf16.mxu0 %v480_v8  ;;  %464 = vmatprep.subr.bf16.mxu1 %v480_v8 }
  0x1b   :  { %439 = vmatpush3.bf16.msra.mxu0 %v480_v8  ;;  %472 = vmatpush3.bf16.msra.mxu1 %v480_v8 }
  0x1c   :  { %440 = vmatprep.subr.bf16.mxu0 %v481_v9  ;;  %465 = vmatprep.subr.bf16.mxu1 %v481_v9 }
  0x1f   :  { %441 = vmatpush3.bf16.msra.mxu0 %v481_v9  ;;  %473 = vmatpush3.bf16.msra.mxu1 %v481_v9 }
  0x22   :  { %443 = vmatmul.mubr.bf16.vlgmr.msra.gmra.mrb[0].mxu0 %v484_v10  ;;  %451 = vmatmul.mubr.bf16.vlgmr.msra.gmra.mrb[0].mxu1 %v485_v11 }
  0x23   :  { %446 = vmatprep.mubr.bf16.mxu0 %v486_v12  ;;  %454 = vmatprep.mubr.bf16.mxu1 %v487_v13 }
  0x2a   :  { %447 = vmatmul.mubr.bf16.gmra.mrb[4].mxu0 %v488_v14  ;;  %455 = vmatmul.mubr.bf16.gmra.mrb[4].mxu1 %v489_v15 }
  0xf5   :  { %v444_v17 = vpop.f32.mrb[0].mxu0  ;;  %v452_v18 = vpop.f32.mrb[0].mxu1 }
  0xf6   :  { %v341_v19 = vadd.f32 %v444_v17, %v409_v16  ;;  %v349_v20 = vadd.f32 %v452_v18, %v409_v16  ;;  %v218_v21 = vpop.f32.mrb[1].mxu0  ;;  %v250_v22 = vpop.f32.mrb[1].mxu1 }
  0xf7   :  { %v339_v23 = vadd.f32 %v409_v16, %v218_v21  ;;  %v347_v24 = vadd.f32 %v409_v16, %v250_v22  ;;  %v445_v25 = vpop.f32.mrb[2].mxu0  ;;  %v453_v26 = vpop.f32.mrb[2].mxu1 }
  0xf8   :  { %v357_v27 = vmax.f32 %v341_v19, 0.0  ;;  %v365_v28 = vmax.f32 %v349_v20, 0.0  ;;  %v342_v29 = vadd.f32 %v445_v25, %v409_v16  ;;  %v350_v30 = vadd.f32 %v453_v26, %v409_v16  ;;  %v221_v31 = vpop.f32.mrb[3].mxu0  ;;  %v253_v32 = vpop.f32.mrb[3].mxu1 }
  0xf9   :  { %v355_v33 = vmax.f32 %v339_v23, 0.0  ;;  %v363_v34 = vmax.f32 %v347_v24, 0.0  ;;  %v340_v35 = vadd.f32 %v409_v16, %v221_v31  ;;  %v348_v36 = vadd.f32 %v409_v16, %v253_v32 }
  0xfa   :  { %373 = vst [vmem:[%s612_s3 + $0x10] sm:$0xff] %v357_v27  ;;  %381 = vst [vmem:[%s612_s3 + $0x50] sm:$0xff] %v365_v28  ;;  %v358_v37 = vmax.f32 %v342_v29, 0.0  ;;  %v366_v38 = vmax.f32 %v350_v30, 0.0 }
  0xfb   :  { %371 = vst [vmem:[%s612_s3] sm:$0xff] %v355_v33  ;;  %379 = vst [vmem:[%s612_s3 + $0x40] sm:$0xff] %v363_v34  ;;  %v356_v39 = vmax.f32 %v340_v35, 0.0  ;;  %v364_v40 = vmax.f32 %v348_v36, 0.0 }
  0xfc   :  { %374 = vst [vmem:[%s612_s3 + $0x18] sm:$0xff] %v358_v37  ;;  %382 = vst [vmem:[%s612_s3 + $0x58] sm:$0xff] %v366_v38 }
  0xfd   :  { %372 = vst [vmem:[%s612_s3 + $0x8] sm:$0xff] %v356_v39  ;;  %380 = vst [vmem:[%s612_s3 + $0x48] sm:$0xff] %v364_v40  ;;  %v448_v41 = vpop.f32.mrb[4].mxu0  ;;  %v456_v42 = vpop.f32.mrb[4].mxu1 }
  0xfe   :  { %v345_v43 = vadd.f32 %v448_v41, %v409_v16  ;;  %v353_v44 = vadd.f32 %v456_v42, %v409_v16  ;;  %v234_v45 = vpop.f32.mrb[5].mxu0  ;;  %v266_v46 = vpop.f32.mrb[5].mxu1 }
  0xff   :  { %v343_v47 = vadd.f32 %v409_v16, %v234_v45  ;;  %v351_v48 = vadd.f32 %v409_v16, %v266_v46  ;;  %v449_v49 = vpop.f32.mrb[6].mxu0  ;;  %v457_v50 = vpop.f32.mrb[6].mxu1 }
 0x100   :  { %v361_v51 = vmax.f32 %v345_v43, 0.0  ;;  %v369_v52 = vmax.f32 %v353_v44, 0.0  ;;  %v346_v53 = vadd.f32 %v449_v49, %v409_v16  ;;  %v354_v54 = vadd.f32 %v457_v50, %v409_v16  ;;  %v237_v55 = vpop.f32.mrb[7].mxu0  ;;  %v269_v56 = vpop.f32.mrb[7].mxu1 }
 0x101   :  { %v359_v57 = vmax.f32 %v343_v47, 0.0  ;;  %v367_v58 = vmax.f32 %v351_v48, 0.0  ;;  %v344_v59 = vadd.f32 %v409_v16, %v237_v55  ;;  %v352_v60 = vadd.f32 %v409_v16, %v269_v56 }
 0x102   :  { %377 = vst [vmem:[%s612_s3 + $0x30] sm:$0xff] %v361_v51  ;;  %385 = vst [vmem:[%s612_s3 + $0x70] sm:$0xff] %v369_v52  ;;  %v362_v61 = vmax.f32 %v346_v53, 0.0  ;;  %v370_v62 = vmax.f32 %v354_v54, 0.0 }
 0x103   :  { %375 = vst [vmem:[%s612_s3 + $0x20] sm:$0xff] %v359_v57  ;;  %383 = vst [vmem:[%s612_s3 + $0x60] sm:$0xff] %v367_v58  ;;  %v360_v63 = vmax.f32 %v344_v59, 0.0  ;;  %v368_v0 = vmax.f32 %v352_v60, 0.0 }
 0x104   :  { %378 = vst [vmem:[%s612_s3 + $0x38] sm:$0xff] %v362_v61  ;;  %386 = vst [vmem:[%s612_s3 + $0x78] sm:$0xff] %v370_v62 }
 0x105   :  { %376 = vst [vmem:[%s612_s3 + $0x28] sm:$0xff] %v360_v63  ;;  %384 = vst [vmem:[%s612_s3 + $0x68] sm:$0xff] %v368_v0 }

// kernel: roland_lp_forward.5
= control target key start
LH: loop header
LB: loop body
LE: loop exit
PB: predicated region body
PF: predicated region fallthrough
CT: control target
= control target key end

     0   :  { %s1142_s1 = inlined_call_operand.vmem [shape: bf16[128,128], index: 1, kind: input, shape index: {}]   ;;  %s1143_s0 = inlined_call_operand.vmem [shape: bf16[128,128], index: 0, kind: input, shape index: {}]   ;;  %s1144_s3 = inlined_call_operand.vmem [shape: f32[128,128], index: 3, kind: input, shape index: {}]   ;;  %s1145_s2 = inlined_call_operand.vmem [shape: f32[1,128], index: 2, kind: input, shape index: {}]   ;;  %s1146_s4 = inlined_call_operand.vmem [shape: f32[128,128], index: 4, kind: output, shape index: {0}]   ;;  %s1147_s5 = inlined_call_operand.vmem [shape: bf16[128,128], index: 5, kind: output, shape index: {1}]  }
   0x1   :  { %v907_v0 = vld [vmem:[%s1142_s1] sm:$0xff]   ;;  %v908_v1 = vld [vmem:[%s1142_s1 + $0x8] sm:$0xff]   ;;  %v909_v2 = vld [vmem:[%s1142_s1 + $0x10] sm:$0xff]  }
   0x2   :  { %787 = vmatprep.subr.bf16.mxu0 %v907_v0  ;;  %v910_v3 = vld [vmem:[%s1142_s1 + $0x18] sm:$0xff]   ;;  %v915_v4 = vld [vmem:[%s1143_s0] sm:$0xff]   ;;  %v912_v6 = vld [vmem:[%s1142_s1 + $0x28] sm:$0xff]  }
   0x3   :  { %788 = vmatpush3.bf16.msra.mxu0 %v907_v0  ;;  %803 = vmatprep.mubr.bf16.mxu0 %v915_v4  ;;  %v911_v5 = vld [vmem:[%s1142_s1 + $0x20] sm:$0xff]   ;;  %v393_v8 = vld [vmem:[%s1144_s3 + $0x8] sm:$0xff]  ;;  %v394_v9 = vld [vmem:[%s1144_s3 + $0x10] sm:$0xff] }
   0x4   :  { %789 = vmatprep.subr.bf16.mxu0 %v908_v1  ;;  %v392_v7 = vld [vmem:[%s1144_s3] sm:$0xff]  ;;  %v395_v11 = vld [vmem:[%s1144_s3 + $0x18] sm:$0xff]  ;;  %v397_v14 = vld [vmem:[%s1144_s3 + $0x28] sm:$0xff] }
   0x5   :  { %v875_v10 = vpack.c.bf16 %v393_v8, %v392_v7  ;;  %v879_v12 = vpack.c.bf16 %v395_v11, %v394_v9  ;;  %v396_v13 = vld [vmem:[%s1144_s3 + $0x20] sm:$0xff]  ;;  %v913_v15 = vld [vmem:[%s1142_s1 + $0x30] sm:$0xff]   ;;  %v399_v18 = vld [vmem:[%s1144_s3 + $0x38] sm:$0xff] }
   0x6   :  { %v883_v16 = vpack.c.bf16 %v397_v14, %v396_v13  ;;  %v398_v17 = vld [vmem:[%s1144_s3 + $0x30] sm:$0xff]  ;;  %v914_v19 = vld [vmem:[%s1142_s1 + $0x38] sm:$0xff]   ;;  %v400_v21 = vld [vmem:[%s1144_s3 + $0x40] sm:$0xff] }
   0x7   :  { %790 = vmatpush3.bf16.msra.mxu0 %v908_v1  ;;  %876 = vmatprep.subr.bf16.mxu1 %v875_v10  ;;  %v887_v20 = vpack.c.bf16 %v399_v18, %v398_v17  ;;  %v401_v22 = vld [vmem:[%s1144_s3 + $0x48] sm:$0xff]  ;;  %v402_v25 = vld [vmem:[%s1144_s3 + $0x50] sm:$0xff]  ;;  %v403_v26 = vld [vmem:[%s1144_s3 + $0x58] sm:$0xff] }
   0x8   :  { %791 = vmatprep.subr.bf16.mxu0 %v909_v2  ;;  %878 = vmatpush3.bf16.msra.mxu1 %v875_v10  ;;  %v891_v23 = vpack.c.bf16 %v401_v22, %v400_v21  ;;  %v916_v24 = vld [vmem:[%s1143_s0 + $0x8] sm:$0xff]   ;;  %v917_v27 = vld [vmem:[%s1143_s0 + $0x10] sm:$0xff]   ;;  %v895_v28 = vpack.c.bf16 %v403_v26, %v402_v25  ;;  %v918_v29 = vld [vmem:[%s1143_s0 + $0x18] sm:$0xff]  }
   0x9   :  { %880 = vmatprep.subr.bf16.mxu1 %v879_v12  ;;  %v919_v30 = vld [vmem:[%s1143_s0 + $0x20] sm:$0xff]   ;;  %v920_v31 = vld [vmem:[%s1143_s0 + $0x28] sm:$0xff]   ;;  %v921_v32 = vld [vmem:[%s1143_s0 + $0x30] sm:$0xff]  }
   0xa   :  { %v922_v33 = vld [vmem:[%s1143_s0 + $0x38] sm:$0xff]   ;;  %v404_v34 = vld [vmem:[%s1144_s3 + $0x60] sm:$0xff]  ;;  %v405_v35 = vld [vmem:[%s1144_s3 + $0x68] sm:$0xff] }
   0xb   :  { %792 = vmatpush3.bf16.msra.mxu0 %v909_v2  ;;  %v899_v36 = vpack.c.bf16 %v405_v35, %v404_v34  ;;  %v406_v37 = vld [vmem:[%s1144_s3 + $0x70] sm:$0xff]  ;;  %v407_v38 = vld [vmem:[%s1144_s3 + $0x78] sm:$0xff]  ;;  %v1052_v40 = vld [vmem:[%s1145_s2] ss:$0 sm:$0xff] }
   0xc   :  { %793 = vmatprep.subr.bf16.mxu0 %v910_v3  ;;  %882 = vmatpush3.bf16.msra.mxu1 %v879_v12  ;;  %v903_v39 = vpack.c.bf16 %v407_v38, %v406_v37 }
   0xd   :  { %884 = vmatprep.subr.bf16.mxu1 %v883_v16 }
   0xf   :  { %794 = vmatpush3.bf16.msra.mxu0 %v910_v3 }
  0x10   :  { %795 = vmatprep.subr.bf16.mxu0 %v911_v5  ;;  %886 = vmatpush3.bf16.msra.mxu1 %v883_v16 }
  0x11   :  { %888 = vmatprep.subr.bf16.mxu1 %v887_v20 }
  0x13   :  { %796 = vmatpush3.bf16.msra.mxu0 %v911_v5 }
  0x14   :  { %797 = vmatprep.subr.bf16.mxu0 %v912_v6  ;;  %890 = vmatpush3.bf16.msra.mxu1 %v887_v20 }
  0x15   :  { %892 = vmatprep.subr.bf16.mxu1 %v891_v23 }
  0x17   :  { %798 = vmatpush3.bf16.msra.mxu0 %v912_v6 }
  0x18   :  { %799 = vmatprep.subr.bf16.mxu0 %v913_v15  ;;  %894 = vmatpush3.bf16.msra.mxu1 %v891_v23 }
  0x19   :  { %896 = vmatprep.subr.bf16.mxu1 %v895_v28 }
  0x1b   :  { %800 = vmatpush3.bf16.msra.mxu0 %v913_v15 }
  0x1c   :  { %801 = vmatprep.subr.bf16.mxu0 %v914_v19  ;;  %898 = vmatpush3.bf16.msra.mxu1 %v895_v28 }
  0x1d   :  { %900 = vmatprep.subr.bf16.mxu1 %v899_v36 }
  0x1f   :  { %802 = vmatpush3.bf16.msra.mxu0 %v914_v19 }
  0x20   :  { %902 = vmatpush3.bf16.msra.mxu1 %v899_v36 }
  0x21   :  { %904 = vmatprep.subr.bf16.mxu1 %v903_v39 }
  0x22   :  { %804 = vmatmul.mubr.bf16.vlgmr.msra.gmra.mrb[0].mxu0 %v916_v24 }
  0x23   :  { %807 = vmatprep.mubr.bf16.mxu0 %v917_v27 }
  0x24   :  { %906 = vmatpush3.bf16.msra.mxu1 %v903_v39 }
  0x2a   :  { %808 = vmatmul.mubr.bf16.gmra.mrb[4].mxu0 %v918_v29 }
  0x2b   :  { %811 = vmatprep.mubr.bf16.mxu0 %v919_v30 }
  0x32   :  { %812 = vmatmul.mubr.bf16.gmra.mrb[8].mxu0 %v920_v31 }
  0x33   :  { %815 = vmatprep.mubr.bf16.mxu0 %v921_v32 }
  0x3a   :  { %816 = vmatmul.mubr.bf16.gmra.mrb[12].mxu0 %v922_v33 }
  0xf5   :  { %v805_v41 = vpop.f32.mrb[0].mxu0 }
  0xf6   :  { %v346_v42 = vadd.f32 %v805_v41, %v1052_v40  ;;  %v223_v43 = vpop.f32.mrb[1].mxu0 }
  0xf7   :  { %v344_v44 = vadd.f32 %v1052_v40, %v223_v43  ;;  %v806_v45 = vpop.f32.mrb[2].mxu0 }
  0xf8   :  { %v362_v46 = vmax.f32 %v346_v42, 0.0  ;;  %v347_v47 = vadd.f32 %v806_v45, %v1052_v40  ;;  %v226_v48 = vpop.f32.mrb[3].mxu0 }
  0xf9   :  { %v360_v49 = vmax.f32 %v344_v44, 0.0  ;;  %v345_v50 = vadd.f32 %v1052_v40, %v226_v48 }
  0xfa   :  { %378 = vst [vmem:[%s1146_s4 + $0x10] sm:$0xff] %v362_v46  ;;  %v363_v51 = vmax.f32 %v347_v47, 0.0 }
  0xfb   :  { %376 = vst [vmem:[%s1146_s4] sm:$0xff] %v360_v49  ;;  %v361_v52 = vmax.f32 %v345_v50, 0.0  ;;  %851 = vmatprep.mubr.f32.mxu1 %v360_v49 }
  0xfc   :  { %379 = vst [vmem:[%s1146_s4 + $0x18] sm:$0xff] %v363_v51 }
  0xfd   :  { %377 = vst [vmem:[%s1146_s4 + $0x8] sm:$0xff] %v361_v52  ;;  %v809_v53 = vpop.f32.mrb[4].mxu0  ;;  %852 = vmatmul.mubr.f32.vlgmr.msra.gmra.mrb[0].mxu1 %v361_v52 }
  0xfe   :  { %v350_v54 = vadd.f32 %v809_v53, %v1052_v40  ;;  %v239_v55 = vpop.f32.mrb[5].mxu0  ;;  %854 = vmatprep.mubr.f32.mxu1 %v362_v46 }
  0xff   :  { %v348_v56 = vadd.f32 %v1052_v40, %v239_v55  ;;  %v810_v57 = vpop.f32.mrb[6].mxu0 }
 0x100   :  { %v366_v58 = vmax.f32 %v350_v54, 0.0  ;;  %v351_v59 = vadd.f32 %v810_v57, %v1052_v40  ;;  %v242_v60 = vpop.f32.mrb[7].mxu0 }
 0x101   :  { %v364_v61 = vmax.f32 %v348_v56, 0.0  ;;  %v349_v62 = vadd.f32 %v1052_v40, %v242_v60  ;;  %855 = vmatmul.mubr.f32.gmra.mrb[2].mxu1 %v363_v51 }
 0x102   :  { %382 = vst [vmem:[%s1146_s4 + $0x30] sm:$0xff] %v366_v58  ;;  %v367_v63 = vmax.f32 %v351_v59, 0.0 }
 0x103   :  { %380 = vst [vmem:[%s1146_s4 + $0x20] sm:$0xff] %v364_v61  ;;  %v365_v0 = vmax.f32 %v349_v62, 0.0  ;;  %857 = vmatprep.mubr.f32.mxu1 %v364_v61 }
 0x104   :  { %383 = vst [vmem:[%s1146_s4 + $0x38] sm:$0xff] %v367_v63 }
 0x105   :  { %381 = vst [vmem:[%s1146_s4 + $0x28] sm:$0xff] %v365_v0  ;;  %v813_v1 = vpop.f32.mrb[8].mxu0  ;;  %858 = vmatmul.mubr.f32.gmra.mrb[4].mxu1 %v365_v0 }
 0x106   :  { %v354_v2 = vadd.f32 %v813_v1, %v1052_v40  ;;  %v255_v3 = vpop.f32.mrb[9].mxu0  ;;  %860 = vmatprep.mubr.f32.mxu1 %v366_v58 }
 0x107   :  { %v352_v4 = vadd.f32 %v1052_v40, %v255_v3  ;;  %v814_v5 = vpop.f32.mrb[10].mxu0 }
 0x108   :  { %v370_v6 = vmax.f32 %v354_v2, 0.0  ;;  %v355_v7 = vadd.f32 %v814_v5, %v1052_v40  ;;  %v258_v8 = vpop.f32.mrb[11].mxu0 }
 0x109   :  { %v368_v9 = vmax.f32 %v352_v4, 0.0  ;;  %v353_v10 = vadd.f32 %v1052_v40, %v258_v8  ;;  %861 = vmatmul.mubr.f32.gmra.mrb[6].mxu1 %v367_v63 }
 0x10a   :  { %386 = vst [vmem:[%s1146_s4 + $0x50] sm:$0xff] %v370_v6  ;;  %v371_v11 = vmax.f32 %v355_v7, 0.0 }
 0x10b   :  { %384 = vst [vmem:[%s1146_s4 + $0x40] sm:$0xff] %v368_v9  ;;  %v369_v12 = vmax.f32 %v353_v10, 0.0  ;;  %863 = vmatprep.mubr.f32.mxu1 %v368_v9 }
 0x10c   :  { %387 = vst [vmem:[%s1146_s4 + $0x58] sm:$0xff] %v371_v11 }
 0x10d   :  { %385 = vst [vmem:[%s1146_s4 + $0x48] sm:$0xff] %v369_v12  ;;  %v817_v13 = vpop.f32.mrb[12].mxu0  ;;  %864 = vmatmul.mubr.f32.gmra.mrb[8].mxu1 %v369_v12 }
 0x10e   :  { %v358_v14 = vadd.f32 %v817_v13, %v1052_v40  ;;  %v271_v15 = vpop.f32.mrb[13].mxu0  ;;  %866 = vmatprep.mubr.f32.mxu1 %v370_v6 }
 0x10f   :  { %v356_v16 = vadd.f32 %v1052_v40, %v271_v15  ;;  %v818_v17 = vpop.f32.mrb[14].mxu0 }
 0x110   :  { %v374_v18 = vmax.f32 %v358_v14, 0.0  ;;  %v359_v19 = vadd.f32 %v818_v17, %v1052_v40  ;;  %v274_v20 = vpop.f32.mrb[15].mxu0 }
 0x111   :  { %v372_v21 = vmax.f32 %v356_v16, 0.0  ;;  %v357_v22 = vadd.f32 %v1052_v40, %v274_v20  ;;  %867 = vmatmul.mubr.f32.gmra.mrb[10].mxu1 %v371_v11 }
 0x112   :  { %390 = vst [vmem:[%s1146_s4 + $0x70] sm:$0xff] %v374_v18  ;;  %v375_v23 = vmax.f32 %v359_v19, 0.0 }
 0x113   :  { %388 = vst [vmem:[%s1146_s4 + $0x60] sm:$0xff] %v372_v21  ;;  %v373_v24 = vmax.f32 %v357_v22, 0.0  ;;  %869 = vmatprep.mubr.f32.mxu1 %v372_v21 }
 0x114   :  { %391 = vst [vmem:[%s1146_s4 + $0x78] sm:$0xff] %v375_v23 }
 0x115   :  { %389 = vst [vmem:[%s1146_s4 + $0x68] sm:$0xff] %v373_v24  ;;  %870 = vmatmul.mubr.f32.gmra.mrb[12].mxu1 %v373_v24 }
 0x116   :  { %872 = vmatprep.mubr.f32.mxu1 %v374_v18 }
 0x119   :  { %873 = vmatmul.mubr.f32.gmra.mrb[14].mxu1 %v375_v23 }
 0x1d0   :  { %v853_v25 = vpop.f32.mrb[0].mxu1 }
 0x1d1   :  { %v474_v26 = vpop.f32.mrb[1].mxu1 }
 0x1d2   :  { %v695_v27 = vpack.c.bf16 %v853_v25, %v474_v26 }
 0x1d4   :  { %696 = vst [vmem:[%s1147_s5] sm:$0xff] %v695_v27   ;;  %v856_v28 = vpop.f32.mrb[2].mxu1 }
 0x1d5   :  { %v484_v29 = vpop.f32.mrb[3].mxu1 }
 0x1d6   :  { %v700_v30 = vpack.c.bf16 %v856_v28, %v484_v29 }
 0x1d8   :  { %732 = vst [vmem:[%s1147_s5 + $0x8] sm:$0xff] %v700_v30   ;;  %v859_v31 = vpop.f32.mrb[4].mxu1 }
 0x1d9   :  { %v494_v32 = vpop.f32.mrb[5].mxu1 }
 0x1da   :  { %v705_v33 = vpack.c.bf16 %v859_v31, %v494_v32 }
 0x1dc   :  { %733 = vst [vmem:[%s1147_s5 + $0x10] sm:$0xff] %v705_v33   ;;  %v862_v34 = vpop.f32.mrb[6].mxu1 }
 0x1dd   :  { %v504_v35 = vpop.f32.mrb[7].mxu1 }
 0x1de   :  { %v710_v36 = vpack.c.bf16 %v862_v34, %v504_v35 }
 0x1e0   :  { %734 = vst [vmem:[%s1147_s5 + $0x18] sm:$0xff] %v710_v36   ;;  %v865_v37 = vpop.f32.mrb[8].mxu1 }
 0x1e1   :  { %v514_v38 = vpop.f32.mrb[9].mxu1 }
 0x1e2   :  { %v715_v39 = vpack.c.bf16 %v865_v37, %v514_v38 }
 0x1e4   :  { %735 = vst [vmem:[%s1147_s5 + $0x20] sm:$0xff] %v715_v39   ;;  %v868_v40 = vpop.f32.mrb[10].mxu1 }
 0x1e5   :  { %v524_v41 = vpop.f32.mrb[11].mxu1 }
 0x1e6   :  { %v720_v42 = vpack.c.bf16 %v868_v40, %v524_v41 }
 0x1e8   :  { %736 = vst [vmem:[%s1147_s5 + $0x28] sm:$0xff] %v720_v42   ;;  %v871_v43 = vpop.f32.mrb[12].mxu1 }
 0x1e9   :  { %v534_v44 = vpop.f32.mrb[13].mxu1 }
 0x1ea   :  { %v725_v45 = vpack.c.bf16 %v871_v43, %v534_v44 }
 0x1ec   :  { %737 = vst [vmem:[%s1147_s5 + $0x30] sm:$0xff] %v725_v45   ;;  %v874_v46 = vpop.f32.mrb[14].mxu1 }
 0x1ed   :  { %v544_v47 = vpop.f32.mrb[15].mxu1 }
 0x1ee   :  { %v730_v48 = vpack.c.bf16 %v874_v46, %v544_v47 }
 0x1f0   :  { %738 = vst [vmem:[%s1147_s5 + $0x38] sm:$0xff] %v730_v48  }

// kernel: roland_lp_forward.4
= control target key start
LH: loop header
LB: loop body
LE: loop exit
PB: predicated region body
PF: predicated region fallthrough
CT: control target
= control target key end

     0   :  { %11 = vsyncpa [#allocation3], 0  ;;  %s1492_s0 = inlined_call_operand.vmem [shape: bf16[128,128], index: 0, kind: input, shape index: {}]   ;;  %s1493_s1 = inlined_call_operand.hbm [shape: bf16[128,256], index: 1, kind: input, shape index: {}]   ;;  %s1494_s2 = inlined_call_operand.vmem [shape: f32[1,256], index: 2, kind: input, shape index: {}]   ;;  %s1495_s3 = inlined_call_operand.hbm [shape: bf16[256,128], index: 3, kind: input, shape index: {}]   ;;  %s1496_s4 = inlined_call_operand.vmem [shape: f32[1,128], index: 4, kind: input, shape index: {}]   ;;  %s1497_s5 = inlined_call_operand.hbm [shape: bf16[128,128], index: 5, kind: input, shape index: {}]   ;;  %s1498_s6 = inlined_call_operand.vmem [shape: bf16[128,128], index: 6, kind: output, shape index: {}]  }
   0x1   :  { %12 = vsyncpa [#allocation5], 0  ;;  %s1291_s21 = smov [#allocation4]   ;;  %s1221_s25 = scalar_lea.hbm %s1495_s3, 2048 }
   0x2   :  { %s34_s22 = sshll.u32 %s1291_s21, 4  ;;  %p1222_p0 = scmp.ne.s32.totalorder %s1495_s3, %s1221_s25  ;;  %s35_s22 = int_to_ptr.vmem [resolvable:$true] %s34_s22 }
   0x3   :  { %p1225_p1 = scmp.lt.u32.totalorder %s1221_s25, %s1495_s3 }
   0x5   :  { %p1227_p2 = pnand %p1225_p1, %p1222_p0 }
   0x7   :  { %1230 = shalt.err (!%p1227_p2)
}
   0x8   :  { %s1231_s30 = scalar_lea.vmem %s35_s22, 2048  ;;  %p1236_p4 = scmp.lt.s32.totalorder %s35_s22, %s35_s22 }
   0x9   :  { %p1232_p3 = scmp.ne.s32.totalorder %s35_s22, %s1231_s30  ;;  %p1237_p5 = scmp.lt.s32.totalorder %s1231_s30, %s1231_s30 }
   0xb   :  { %p1238_p6 = por %p1237_p5, %p1236_p4 }
   0xd   :  { %p1239_p7 = pnand %p1238_p6, %p1232_p3 }
   0xf   :  { %1242 = shalt.err (!%p1239_p7)
}
  0x10   :  { %s1292_s7 = smov 64   ;;  %s1293_s8 = smov 4  }
  0x11   :  { %40 = dma.hbm_to_vmem [thread:$0]  %s1495_s3, 2048, %s35_s22, [#allocation5], %s1292_s7, %s1292_s7, %s1293_s8  }
  0x12   :  { %s1294_s11 = smov [#allocation2]   ;;  %s1243_s15 = scalar_lea.hbm %s1493_s1, 2048 }
  0x13   :  { %s20_s12 = sshll.u32 %s1294_s11, 4  ;;  %p1244_p8 = scmp.ne.s32.totalorder %s1493_s1, %s1243_s15  ;;  %s21_s12 = int_to_ptr.vmem [resolvable:$true] %s20_s12 }
  0x14   :  { %p1247_p9 = scmp.lt.u32.totalorder %s1243_s15, %s1493_s1 }
  0x16   :  { %p1249_p10 = pnand %p1247_p9, %p1244_p8 }
  0x18   :  { %1252 = shalt.err (!%p1249_p10)
}
  0x19   :  { %s1253_s20 = scalar_lea.vmem %s21_s12, 2048  ;;  %p1258_p12 = scmp.lt.s32.totalorder %s21_s12, %s21_s12 }
  0x1a   :  { %p1254_p11 = scmp.ne.s32.totalorder %s21_s12, %s1253_s20  ;;  %p1259_p13 = scmp.lt.s32.totalorder %s1253_s20, %s1253_s20 }
  0x1c   :  { %p1260_p0 = por %p1259_p13, %p1258_p12 }
  0x1e   :  { %p1261_p1 = pnand %p1260_p0, %p1254_p11 }
  0x20   :  { %1264 = shalt.err (!%p1261_p1)
}
  0x21   :  { %s1295_s3 = smov 128   ;;  %s1296_s21 = smov 8  }
  0x22   :  { %26 = dma.hbm_to_vmem [thread:$0]  %s1493_s1, 2048, %s21_s12, [#allocation3], %s1295_s3, %s1295_s3, %s1296_s21  }
  0x23   :  { %s1297_s24 = smov [#allocation6]   ;;  %s1265_s28 = scalar_lea.hbm %s1497_s5, 1024 }
  0x24   :  { %s48_s25 = sshll.u32 %s1297_s24, 4  ;;  %p1266_p2 = scmp.ne.s32.totalorder %s1497_s5, %s1265_s28  ;;  %s49_s25 = int_to_ptr.vmem [resolvable:$true] %s48_s25 }
  0x25   :  { %p1269_p3 = scmp.lt.u32.totalorder %s1265_s28, %s1497_s5 }
  0x27   :  { %p1271_p4 = pnand %p1269_p3, %p1266_p2 }
  0x29   :  { %1274 = shalt.err (!%p1271_p4)
}
  0x2a   :  { %s1275_s11 = scalar_lea.vmem %s49_s25, 1024  ;;  %p1280_p6 = scmp.lt.s32.totalorder %s49_s25, %s49_s25 }
  0x2b   :  { %p1276_p5 = scmp.ne.s32.totalorder %s49_s25, %s1275_s11  ;;  %p1281_p7 = scmp.lt.s32.totalorder %s1275_s11, %s1275_s11 }
  0x2d   :  { %p1282_p8 = por %p1281_p7, %p1280_p6 }
  0x2f   :  { %p1283_p9 = pnand %p1282_p8, %p1276_p5 }
  0x31   :  { %1286 = shalt.err (!%p1283_p9)
}
  0x32   :  { %54 = dma.hbm_to_vmem [thread:$0]  %s1497_s5, 1024, %s49_s25, [#allocation5], %s1292_s7, %s1292_s7, %s1293_s8  }
  0x33   :  { %1287 = dma.done.wait [#allocation3], 2048  }
  0x34   :  { %1288 = vsyncadd [#allocation3], 4294965248 }
  0x35   :  { %1289 = dma.done.wait [#allocation5], 3072  }
  0x36   :  { %1290 = vsyncadd [#allocation5], 4294964224  ;;  %v1298_v0 = vmov 0   ;;  %v1165_v1 = vld [vmem:[#allocation2 + $0x4] ss:$8 sps:$4 sm:$0xff]   ;;  %v1201_v19 = vld [vmem:[#allocation4 + $0x50] sm:$0xff]   ;;  %v99_v44 = vlaneseq }
  0x37   :  { %269 = vmatprep.mubr.bf16.mxu0 %v1298_v0  ;;  %v1167_v2 = vld [vmem:[#allocation2] ss:$8 sps:$4 sm:$0xff]   ;;  %237 = vmatprep.subr.bf16.mxu0 %v1165_v1  ;;  %v1168_v3 = vld [vmem:[#allocation2 + $0x14] ss:$8 sps:$4 sm:$0xff]   ;;  %v1170_v4 = vld [vmem:[#allocation2 + $0x10] ss:$8 sps:$4 sm:$0xff]  }
  0x38   :  { %238 = vmatpush1.bf16.msra.mxu0 %v1167_v2  ;;  %v1171_v5 = vld [vmem:[#allocation2 + $0x24] ss:$8 sps:$4 sm:$0xff]   ;;  %v1173_v6 = vld [vmem:[#allocation2 + $0x20] ss:$8 sps:$4 sm:$0xff]   ;;  %v1174_v7 = vld [vmem:[#allocation2 + $0x34] ss:$8 sps:$4 sm:$0xff]  }
  0x39   :  { %239 = vmatprep.subr.bf16.mxu0 %v1168_v3  ;;  %v1176_v8 = vld [vmem:[#allocation2 + $0x30] ss:$8 sps:$4 sm:$0xff]   ;;  %v1177_v9 = vld [vmem:[#allocation2 + $0x44] ss:$8 sps:$4 sm:$0xff]   ;;  %v1179_v10 = vld [vmem:[#allocation2 + $0x40] ss:$8 sps:$4 sm:$0xff]  }
  0x3a   :  { %v1180_v11 = vld [vmem:[#allocation2 + $0x54] ss:$8 sps:$4 sm:$0xff]   ;;  %v1182_v12 = vld [vmem:[#allocation2 + $0x50] ss:$8 sps:$4 sm:$0xff]   ;;  %v1183_v13 = vld [vmem:[#allocation2 + $0x64] ss:$8 sps:$4 sm:$0xff]  }
  0x3b   :  { %v1197_v14 = vld [vmem:[#allocation4 + $0x40] sm:$0xff]   ;;  %v1199_v17 = vld [vmem:[#allocation4 + $0x48] sm:$0xff]   ;;  %v1186_v20 = vld [vmem:[#allocation2 + $0x74] ss:$8 sps:$4 sm:$0xff]   ;;  %v100_v45 = vshrl.u32 %v99_v44, 7 }
  0x3c   :  { %240 = vmatpush1.bf16.msra.mxu0 %v1170_v4  ;;  %v1198_v15 = vld [vmem:[#allocation4] sm:$0xff]   ;;  %1029 = vmatprep.subr.bf16.mxu1 %v1197_v14  ;;  %v1200_v18 = vld [vmem:[#allocation4 + $0x8] sm:$0xff]   ;;  %v1188_v21 = vld [vmem:[#allocation2 + $0x70] ss:$8 sps:$4 sm:$0xff]  }
  0x3d   :  { %241 = vmatprep.subr.bf16.mxu0 %v1171_v5  ;;  %v1185_v16 = vld [vmem:[#allocation2 + $0x60] ss:$8 sps:$4 sm:$0xff]   ;;  %1030 = vmatpush3.bf16.msra.mxu1 %v1198_v15  ;;  %v1202_v22 = vld [vmem:[#allocation4 + $0x10] sm:$0xff]   ;;  %v1203_v23 = vld [vmem:[#allocation4 + $0x58] sm:$0xff]   ;;  %v101_v46 = vsub.s32 0, %v100_v45  ;;  %v105_v48 = vsub.s32 1, %v100_v45 }
  0x3e   :  { %1031 = vmatprep.subr.bf16.mxu1 %v1199_v17  ;;  %v1189_v24 = vld [vmem:[%s1492_s0] sm:$0xff]   ;;  %v1204_v25 = vld [vmem:[#allocation4 + $0x18] sm:$0xff]   ;;  %v1207_v28 = vld [vmem:[#allocation4 + $0x68] sm:$0xff]  }
  0x3f   :  { %v1205_v26 = vld [vmem:[#allocation4 + $0x60] sm:$0xff]   ;;  %v1190_v29 = vld [vmem:[%s1492_s0 + $0x8] sm:$0xff]   ;;  %v1191_v30 = vld [vmem:[%s1492_s0 + $0x10] sm:$0xff]  }
  0x40   :  { %242 = vmatpush1.bf16.msra.mxu0 %v1173_v6  ;;  %v1206_v27 = vld [vmem:[#allocation4 + $0x20] sm:$0xff]   ;;  %v1192_v31 = vld [vmem:[%s1492_s0 + $0x18] sm:$0xff]   ;;  %v1194_v33 = vld [vmem:[%s1492_s0 + $0x28] sm:$0xff]  }
  0x41   :  { %243 = vmatprep.subr.bf16.mxu0 %v1174_v7  ;;  %1032 = vmatpush3.bf16.msra.mxu1 %v1200_v18  ;;  %v1193_v32 = vld [vmem:[%s1492_s0 + $0x20] sm:$0xff]   ;;  %v1195_v34 = vld [vmem:[%s1492_s0 + $0x30] sm:$0xff]   ;;  %v1196_v35 = vld [vmem:[%s1492_s0 + $0x38] sm:$0xff]  }
  0x42   :  { %1033 = vmatprep.subr.bf16.mxu1 %v1201_v19  ;;  %v1208_v36 = vld [vmem:[#allocation4 + $0x28] sm:$0xff]   ;;  %v1209_v37 = vld [vmem:[#allocation4 + $0x70] sm:$0xff]   ;;  %v1211_v39 = vld [vmem:[#allocation4 + $0x78] sm:$0xff]  }
  0x43   :  { %v1210_v38 = vld [vmem:[#allocation4 + $0x30] sm:$0xff]   ;;  %v1212_v40 = vld [vmem:[#allocation4 + $0x38] sm:$0xff]   ;;  %v1213_v41 = vld [vmem:[#allocation6] sm:$0xff]  }
  0x44   :  { %244 = vmatpush1.bf16.msra.mxu0 %v1176_v8  ;;  %v1214_v42 = vld [vmem:[#allocation6 + $0x8] sm:$0xff]   ;;  %v1215_v43 = vld [vmem:[#allocation6 + $0x10] sm:$0xff]   ;;  %v97_v47 = vld [vmem:[%s1494_s2] sm:$0x3] }
  0x45   :  { %245 = vmatprep.subr.bf16.mxu0 %v1177_v9  ;;  %1034 = vmatpush3.bf16.msra.mxu1 %v1202_v22  ;;  %v1411_v49 = vrot.slane %v97_v47, %v101_v46  ;;  %v1413_v50 = vrot.slane %v97_v47, %v105_v48 }
  0x46   :  { %1035 = vmatprep.subr.bf16.mxu1 %v1203_v23 }
  0x48   :  { %246 = vmatpush1.bf16.msra.mxu0 %v1179_v10 }
  0x49   :  { %247 = vmatprep.subr.bf16.mxu0 %v1180_v11  ;;  %1036 = vmatpush3.bf16.msra.mxu1 %v1204_v25 }
  0x4a   :  { %1037 = vmatprep.subr.bf16.mxu1 %v1205_v26 }
  0x4c   :  { %248 = vmatpush1.bf16.msra.mxu0 %v1182_v12 }
  0x4d   :  { %249 = vmatprep.subr.bf16.mxu0 %v1183_v13  ;;  %1038 = vmatpush3.bf16.msra.mxu1 %v1206_v27 }
  0x4e   :  { %1039 = vmatprep.subr.bf16.mxu1 %v1207_v28 }
  0x50   :  { %250 = vmatpush1.bf16.msra.mxu0 %v1185_v16 }
  0x51   :  { %251 = vmatprep.subr.bf16.mxu0 %v1186_v20  ;;  %1040 = vmatpush3.bf16.msra.mxu1 %v1208_v36 }
  0x52   :  { %1041 = vmatprep.subr.bf16.mxu1 %v1209_v37 }
  0x54   :  { %252 = vmatpush1.bf16.msra.mxu0 %v1188_v21 }
  0x55   :  { %1042 = vmatpush3.bf16.msra.mxu1 %v1210_v38  ;;  %1109 = vmatprep.subr.bf16.mxu0 %v1213_v41 }
  0x56   :  { %1043 = vmatprep.subr.bf16.mxu1 %v1211_v39 }
  0x57   :  { %270 = vmatmul.mubr.bf16.vlgmr.msra.gmra.mrb[0].mxu0 %v1189_v24 }
  0x58   :  { %279 = vmatprep.mubr.bf16.mxu0 %v1298_v0  ;;  %1110 = vmatpush3.bf16.msra.mxu0 %v1213_v41 }
  0x59   :  { %1044 = vmatpush3.bf16.msra.mxu1 %v1212_v40  ;;  %1111 = vmatprep.subr.bf16.mxu0 %v1214_v42 }
  0x5a   :  { %1141 = vmatprep.subr.bf16.mxu1 %v1213_v41 }
  0x5c   :  { %1112 = vmatpush3.bf16.msra.mxu0 %v1214_v42 }
  0x5d   :  { %1113 = vmatprep.subr.bf16.mxu0 %v1215_v43 }
  0x5f   :  { %280 = vmatmul.mubr.bf16.gmra.mrb[4].mxu0 %v1190_v29 }
  0x60   :  { %289 = vmatprep.mubr.bf16.mxu0 %v1298_v0  ;;  %1114 = vmatpush3.bf16.msra.mxu0 %v1215_v43 }
  0x67   :  { %290 = vmatmul.mubr.bf16.gmra.mrb[8].mxu0 %v1191_v30 }
  0x68   :  { %299 = vmatprep.mubr.bf16.mxu0 %v1298_v0 }
  0x6f   :  { %300 = vmatmul.mubr.bf16.gmra.mrb[12].mxu0 %v1192_v31 }
  0x70   :  { %309 = vmatprep.mubr.bf16.mxu0 %v1298_v0 }
  0x77   :  { %310 = vmatmul.mubr.bf16.gmra.mrb[16].mxu0 %v1193_v32 }
  0x78   :  { %319 = vmatprep.mubr.bf16.mxu0 %v1298_v0 }
  0x7f   :  { %320 = vmatmul.mubr.bf16.gmra.mrb[20].mxu0 %v1194_v33 }
  0x80   :  { %329 = vmatprep.mubr.bf16.mxu0 %v1298_v0 }
  0x87   :  { %330 = vmatmul.mubr.bf16.gmra.mrb[24].mxu0 %v1195_v34 }
  0x88   :  { %339 = vmatprep.mubr.bf16.mxu0 %v1298_v0 }
  0x8f   :  { %340 = vmatmul.mubr.bf16.gmra.mrb[28].mxu0 %v1196_v35 }
 0x12a   :  { %v271_v51 = vpop.f32.mrb[0].mxu0 }
 0x12b   :  { %v272_v52 = vadd.f32 %v271_v51, %v1411_v49  ;;  %v273_v53 = vpop.f32.mrb[1].mxu0 }
 0x12c   :  { %v274_v54 = vadd.f32 %v273_v53, %v1413_v50  ;;  %v275_v55 = vpop.f32.mrb[2].mxu0 }
 0x12d   :  { %v276_v56 = vadd.f32 %v275_v55, %v1411_v49  ;;  %v277_v57 = vpop.f32.mrb[3].mxu0  ;;  %v350_v59 = vmax.f32 %v272_v52, 0.0 }
 0x12e   :  { %v278_v58 = vadd.f32 %v277_v57, %v1413_v50  ;;  %v351_v61 = vmax.f32 %v274_v54, 0.0 }
 0x12f   :  { %v352_v60 = vmax.f32 %v276_v56, 0.0 }
 0x130   :  { %v353_v62 = vmax.f32 %v278_v58, 0.0 }
 0x131   :  { %v382_v63 = vpack.c.bf16 %v352_v60, %v350_v59 }
 0x132   :  { %v281_v0 = vpop.f32.mrb[4].mxu0  ;;  %v383_v1 = vpack.c.bf16 %v353_v62, %v351_v61 }
 0x133   :  { %v282_v2 = vadd.f32 %v281_v0, %v1411_v49  ;;  %v283_v3 = vpop.f32.mrb[5].mxu0 }
 0x134   :  { %v284_v4 = vadd.f32 %v283_v3, %v1413_v50  ;;  %v285_v5 = vpop.f32.mrb[6].mxu0  ;;  %565 = vmatprep.mubr.bf16.mxu1 %v383_v1 }
 0x135   :  { %v286_v6 = vadd.f32 %v285_v5, %v1411_v49  ;;  %v287_v7 = vpop.f32.mrb[7].mxu0  ;;  %566 = vmatmul.mubr.bf16.vlgmr.msra.gmra.mrb[0].mxu1 %v382_v63  ;;  %v354_v9 = vmax.f32 %v282_v2, 0.0 }
 0x136   :  { %v288_v8 = vadd.f32 %v287_v7, %v1413_v50  ;;  %1149 = vmatpush3.bf16.msra.mxu1 %v1213_v41  ;;  %v355_v11 = vmax.f32 %v284_v4, 0.0 }
 0x137   :  { %v356_v10 = vmax.f32 %v286_v6, 0.0  ;;  %1142 = vmatprep.subr.bf16.mxu1 %v1214_v42 }
 0x138   :  { %v357_v12 = vmax.f32 %v288_v8, 0.0 }
 0x139   :  { %v384_v13 = vpack.c.bf16 %v356_v10, %v354_v9 }
 0x13a   :  { %v385_v14 = vpack.c.bf16 %v357_v12, %v355_v11  ;;  %v291_v15 = vpop.f32.mrb[8].mxu0  ;;  %1150 = vmatpush3.bf16.msra.mxu1 %v1214_v42 }
 0x13b   :  { %v292_v16 = vadd.f32 %v291_v15, %v1411_v49  ;;  %v293_v17 = vpop.f32.mrb[9].mxu0  ;;  %1143 = vmatprep.subr.bf16.mxu1 %v1215_v43 }
 0x13c   :  { %v294_v18 = vadd.f32 %v293_v17, %v1413_v50  ;;  %v295_v19 = vpop.f32.mrb[10].mxu0  ;;  %573 = vmatprep.mubr.bf16.mxu1 %v385_v14 }
 0x13d   :  { %v296_v20 = vadd.f32 %v295_v19, %v1411_v49  ;;  %v297_v21 = vpop.f32.mrb[11].mxu0  ;;  %574 = vmatmul.mubr.bf16.gmra.mrb[4].mxu1 %v384_v13  ;;  %v358_v23 = vmax.f32 %v292_v16, 0.0 }
 0x13e   :  { %v298_v22 = vadd.f32 %v297_v21, %v1413_v50  ;;  %1151 = vmatpush3.bf16.msra.mxu1 %v1215_v43  ;;  %v359_v25 = vmax.f32 %v294_v18, 0.0 }
 0x13f   :  { %v360_v24 = vmax.f32 %v296_v20, 0.0 }
 0x140   :  { %v361_v26 = vmax.f32 %v298_v22, 0.0 }
 0x141   :  { %v386_v27 = vpack.c.bf16 %v360_v24, %v358_v23 }
 0x142   :  { %v387_v28 = vpack.c.bf16 %v361_v26, %v359_v25  ;;  %v301_v29 = vpop.f32.mrb[12].mxu0 }
 0x143   :  { %v302_v30 = vadd.f32 %v301_v29, %v1411_v49  ;;  %v303_v31 = vpop.f32.mrb[13].mxu0 }
 0x144   :  { %v304_v32 = vadd.f32 %v303_v31, %v1413_v50  ;;  %v305_v33 = vpop.f32.mrb[14].mxu0  ;;  %581 = vmatprep.mubr.bf16.mxu1 %v387_v28 }
 0x145   :  { %v306_v34 = vadd.f32 %v305_v33, %v1411_v49  ;;  %v307_v35 = vpop.f32.mrb[15].mxu0  ;;  %582 = vmatmul.mubr.bf16.gmra.mrb[8].mxu1 %v386_v27  ;;  %v362_v37 = vmax.f32 %v302_v30, 0.0 }
 0x146   :  { %v308_v36 = vadd.f32 %v307_v35, %v1413_v50  ;;  %v363_v39 = vmax.f32 %v304_v32, 0.0 }
 0x147   :  { %v364_v38 = vmax.f32 %v306_v34, 0.0 }
 0x148   :  { %v365_v40 = vmax.f32 %v308_v36, 0.0 }
 0x149   :  { %v388_v41 = vpack.c.bf16 %v364_v38, %v362_v37  ;;  %v1216_v37 = vld [vmem:[#allocation6 + $0x18] sm:$0xff]   ;;  %v1217_v38 = vld [vmem:[#allocation6 + $0x20] sm:$0xff]  }
 0x14a   :  { %v389_v42 = vpack.c.bf16 %v365_v40, %v363_v39  ;;  %v311_v43 = vpop.f32.mrb[16].mxu0  ;;  %1115 = vmatprep.subr.bf16.mxu0 %v1216_v37  ;;  %1144 = vmatprep.subr.bf16.mxu1 %v1216_v37  ;;  %v1220_v39 = vld [vmem:[#allocation6 + $0x38] sm:$0xff]  }
 0x14b   :  { %v312_v44 = vadd.f32 %v311_v43, %v1411_v49  ;;  %v313_v45 = vpop.f32.mrb[17].mxu0  ;;  %1116 = vmatpush3.bf16.msra.mxu0 %v1216_v37  ;;  %1152 = vmatpush3.bf16.msra.mxu1 %v1216_v37 }
 0x14c   :  { %v314_v46 = vadd.f32 %v313_v45, %v1413_v50  ;;  %v315_v47 = vpop.f32.mrb[18].mxu0  ;;  %589 = vmatprep.mubr.bf16.mxu1 %v389_v42  ;;  %1117 = vmatprep.subr.bf16.mxu0 %v1217_v38 }
 0x14d   :  { %v316_v48 = vadd.f32 %v315_v47, %v1411_v49  ;;  %v317_v51 = vpop.f32.mrb[19].mxu0  ;;  %590 = vmatmul.mubr.bf16.gmra.mrb[12].mxu1 %v388_v41  ;;  %v366_v53 = vmax.f32 %v312_v44, 0.0  ;;  %1145 = vmatprep.subr.bf16.mxu1 %v1217_v38  ;;  %v1450_v41 = vld [vmem:[%s1496_s4] ss:$0 sm:$0xff] }
 0x14e   :  { %v318_v52 = vadd.f32 %v317_v51, %v1413_v50  ;;  %v367_v55 = vmax.f32 %v314_v46, 0.0 }
 0x14f   :  { %v368_v54 = vmax.f32 %v316_v48, 0.0  ;;  %1118 = vmatpush3.bf16.msra.mxu0 %v1217_v38  ;;  %1153 = vmatpush3.bf16.msra.mxu1 %v1217_v38 }
 0x150   :  { %v369_v56 = vmax.f32 %v318_v52, 0.0 }
 0x151   :  { %v390_v57 = vpack.c.bf16 %v368_v54, %v366_v53 }
 0x152   :  { %v391_v58 = vpack.c.bf16 %v369_v56, %v367_v55  ;;  %v321_v59 = vpop.f32.mrb[20].mxu0 }
 0x153   :  { %v322_v60 = vadd.f32 %v321_v59, %v1411_v49  ;;  %v323_v61 = vpop.f32.mrb[21].mxu0 }
 0x154   :  { %v324_v62 = vadd.f32 %v323_v61, %v1413_v50  ;;  %v325_v63 = vpop.f32.mrb[22].mxu0  ;;  %597 = vmatprep.mubr.bf16.mxu1 %v391_v58 }
 0x155   :  { %v326_v0 = vadd.f32 %v325_v63, %v1411_v49  ;;  %v327_v1 = vpop.f32.mrb[23].mxu0  ;;  %598 = vmatmul.mubr.bf16.gmra.mrb[16].mxu1 %v390_v57  ;;  %v370_v3 = vmax.f32 %v322_v60, 0.0 }
 0x156   :  { %v328_v2 = vadd.f32 %v327_v1, %v1413_v50  ;;  %v371_v5 = vmax.f32 %v324_v62, 0.0 }
 0x157   :  { %v372_v4 = vmax.f32 %v326_v0, 0.0 }
 0x158   :  { %v373_v6 = vmax.f32 %v328_v2, 0.0 }
 0x159   :  { %v392_v7 = vpack.c.bf16 %v372_v4, %v370_v3 }
 0x15a   :  { %v393_v8 = vpack.c.bf16 %v373_v6, %v371_v5  ;;  %v331_v9 = vpop.f32.mrb[24].mxu0 }
 0x15b   :  { %v332_v10 = vadd.f32 %v331_v9, %v1411_v49  ;;  %v333_v11 = vpop.f32.mrb[25].mxu0 }
 0x15c   :  { %v334_v12 = vadd.f32 %v333_v11, %v1413_v50  ;;  %v335_v13 = vpop.f32.mrb[26].mxu0  ;;  %605 = vmatprep.mubr.bf16.mxu1 %v393_v8 }
 0x15d   :  { %v336_v14 = vadd.f32 %v335_v13, %v1411_v49  ;;  %v337_v15 = vpop.f32.mrb[27].mxu0  ;;  %606 = vmatmul.mubr.bf16.gmra.mrb[20].mxu1 %v392_v7  ;;  %v374_v17 = vmax.f32 %v332_v10, 0.0 }
 0x15e   :  { %v338_v16 = vadd.f32 %v337_v15, %v1413_v50  ;;  %v375_v19 = vmax.f32 %v334_v12, 0.0 }
 0x15f   :  { %v376_v18 = vmax.f32 %v336_v14, 0.0 }
 0x160   :  { %v377_v20 = vmax.f32 %v338_v16, 0.0 }
 0x161   :  { %v394_v21 = vpack.c.bf16 %v376_v18, %v374_v17 }
 0x162   :  { %v395_v22 = vpack.c.bf16 %v377_v20, %v375_v19  ;;  %v341_v23 = vpop.f32.mrb[28].mxu0 }
 0x163   :  { %v342_v24 = vadd.f32 %v341_v23, %v1411_v49  ;;  %v343_v25 = vpop.f32.mrb[29].mxu0 }
 0x164   :  { %v344_v26 = vadd.f32 %v343_v25, %v1413_v50  ;;  %v345_v27 = vpop.f32.mrb[30].mxu0  ;;  %613 = vmatprep.mubr.bf16.mxu1 %v395_v22 }
 0x165   :  { %v346_v28 = vadd.f32 %v345_v27, %v1411_v49  ;;  %v347_v29 = vpop.f32.mrb[31].mxu0  ;;  %614 = vmatmul.mubr.bf16.gmra.mrb[24].mxu1 %v394_v21  ;;  %v378_v31 = vmax.f32 %v342_v24, 0.0  ;;  %v1218_v49 = vld [vmem:[#allocation6 + $0x28] sm:$0xff]  }
 0x166   :  { %v348_v30 = vadd.f32 %v347_v29, %v1413_v50  ;;  %v379_v33 = vmax.f32 %v344_v26, 0.0  ;;  %1119 = vmatprep.subr.bf16.mxu0 %v1218_v49  ;;  %1146 = vmatprep.subr.bf16.mxu1 %v1218_v49  ;;  %v1219_v50 = vld [vmem:[#allocation6 + $0x30] sm:$0xff]  }
 0x167   :  { %v380_v32 = vmax.f32 %v346_v28, 0.0  ;;  %1120 = vmatpush3.bf16.msra.mxu0 %v1218_v49  ;;  %1154 = vmatpush3.bf16.msra.mxu1 %v1218_v49 }
 0x168   :  { %v381_v34 = vmax.f32 %v348_v30, 0.0  ;;  %1121 = vmatprep.subr.bf16.mxu0 %v1219_v50  ;;  %1147 = vmatprep.subr.bf16.mxu1 %v1219_v50 }
 0x169   :  { %v396_v35 = vpack.c.bf16 %v380_v32, %v378_v31 }
 0x16a   :  { %v397_v36 = vpack.c.bf16 %v381_v34, %v379_v33 }
 0x16b   :  { %1122 = vmatpush3.bf16.msra.mxu0 %v1219_v50  ;;  %1155 = vmatpush3.bf16.msra.mxu1 %v1219_v50 }
 0x16c   :  { %621 = vmatprep.mubr.bf16.mxu1 %v397_v36  ;;  %1123 = vmatprep.subr.bf16.mxu0 %v1220_v39 }
 0x16d   :  { %622 = vmatmul.mubr.bf16.gmra.mrb[28].mxu1 %v396_v35  ;;  %1148 = vmatprep.subr.bf16.mxu1 %v1220_v39 }
 0x16f   :  { %1124 = vmatpush3.bf16.msra.mxu0 %v1220_v39  ;;  %1156 = vmatpush3.bf16.msra.mxu1 %v1220_v39 }
 0x208   :  { %v1045_v40 = vpop.f32.mrb[0].mxu1 }
 0x209   :  { %v1046_v42 = vpop.f32.mrb[1].mxu1 }
 0x20a   :  { %v1047_v43 = vadd.f32 %v1046_v42, %v1045_v40  ;;  %v1048_v44 = vpop.f32.mrb[2].mxu1 }
 0x20b   :  { %v1049_v45 = vpop.f32.mrb[3].mxu1 }
 0x20c   :  { %v568_v46 = vadd.f32 %v1047_v43, %v1450_v41  ;;  %v1050_v47 = vadd.f32 %v1049_v45, %v1048_v44 }
 0x20e   :  { %v571_v48 = vadd.f32 %v1050_v47, %v1450_v41  ;;  %v630_v51 = vmax.f32 %v568_v46, 0.0 }
 0x210   :  { %v631_v52 = vmax.f32 %v571_v48, 0.0  ;;  %v1051_v53 = vpop.f32.mrb[4].mxu1 }
 0x211   :  { %v1052_v54 = vpop.f32.mrb[5].mxu1 }
 0x212   :  { %v1053_v55 = vadd.f32 %v1052_v54, %v1051_v53  ;;  %v1054_v56 = vpop.f32.mrb[6].mxu1  ;;  %v646_v57 = vpack.c.bf16 %v631_v52, %v630_v51 }
 0x213   :  { %v1055_v58 = vpop.f32.mrb[7].mxu1 }
 0x214   :  { %v576_v59 = vadd.f32 %v1053_v55, %v1450_v41  ;;  %v1056_v60 = vadd.f32 %v1055_v58, %v1054_v56  ;;  %1125 = vmatprep.mubr.bf16.mxu0 %v646_v57 }
 0x216   :  { %v579_v61 = vadd.f32 %v1056_v60, %v1450_v41  ;;  %v632_v62 = vmax.f32 %v576_v59, 0.0 }
 0x218   :  { %v633_v63 = vmax.f32 %v579_v61, 0.0  ;;  %v1057_v0 = vpop.f32.mrb[8].mxu1 }
 0x219   :  { %v1058_v1 = vpop.f32.mrb[9].mxu1 }
 0x21a   :  { %v647_v2 = vpack.c.bf16 %v633_v63, %v632_v62  ;;  %v1059_v3 = vadd.f32 %v1058_v1, %v1057_v0  ;;  %v1060_v4 = vpop.f32.mrb[10].mxu1 }
 0x21b   :  { %v1061_v5 = vpop.f32.mrb[11].mxu1 }
 0x21c   :  { %v584_v6 = vadd.f32 %v1059_v3, %v1450_v41  ;;  %v1062_v7 = vadd.f32 %v1061_v5, %v1060_v4  ;;  %1126 = vmatmul.mubr.bf16.vlgmr.msra.gmra.mrb[32].mxu0 %v647_v2 }
 0x21e   :  { %v587_v8 = vadd.f32 %v1062_v7, %v1450_v41  ;;  %v634_v9 = vmax.f32 %v584_v6, 0.0 }
 0x220   :  { %v635_v10 = vmax.f32 %v587_v8, 0.0  ;;  %v1063_v11 = vpop.f32.mrb[12].mxu1 }
 0x221   :  { %v1064_v12 = vpop.f32.mrb[13].mxu1 }
 0x222   :  { %v1065_v13 = vadd.f32 %v1064_v12, %v1063_v11  ;;  %v1066_v14 = vpop.f32.mrb[14].mxu1  ;;  %v648_v15 = vpack.c.bf16 %v635_v10, %v634_v9 }
 0x223   :  { %v1067_v16 = vpop.f32.mrb[15].mxu1 }
 0x224   :  { %v592_v17 = vadd.f32 %v1065_v13, %v1450_v41  ;;  %v1068_v18 = vadd.f32 %v1067_v16, %v1066_v14  ;;  %1129 = vmatprep.mubr.bf16.mxu0 %v648_v15 }
 0x226   :  { %v595_v19 = vadd.f32 %v1068_v18, %v1450_v41  ;;  %v636_v20 = vmax.f32 %v592_v17, 0.0 }
 0x228   :  { %v637_v21 = vmax.f32 %v595_v19, 0.0  ;;  %v1069_v22 = vpop.f32.mrb[16].mxu1 }
 0x229   :  { %v1070_v23 = vpop.f32.mrb[17].mxu1 }
 0x22a   :  { %v1071_v24 = vadd.f32 %v1070_v23, %v1069_v22  ;;  %v1072_v25 = vpop.f32.mrb[18].mxu1  ;;  %v649_v26 = vpack.c.bf16 %v637_v21, %v636_v20 }
 0x22b   :  { %v1073_v27 = vpop.f32.mrb[19].mxu1 }
 0x22c   :  { %v600_v28 = vadd.f32 %v1071_v24, %v1450_v41  ;;  %v1074_v29 = vadd.f32 %v1073_v27, %v1072_v25  ;;  %1130 = vmatmul.mubr.bf16.gmra.mrb[36].mxu0 %v649_v26 }
 0x22e   :  { %v603_v30 = vadd.f32 %v1074_v29, %v1450_v41  ;;  %v638_v31 = vmax.f32 %v600_v28, 0.0 }
 0x230   :  { %v639_v32 = vmax.f32 %v603_v30, 0.0  ;;  %v1075_v33 = vpop.f32.mrb[20].mxu1 }
 0x231   :  { %v1076_v34 = vpop.f32.mrb[21].mxu1 }
 0x232   :  { %v1077_v35 = vadd.f32 %v1076_v34, %v1075_v33  ;;  %v1078_v36 = vpop.f32.mrb[22].mxu1  ;;  %v650_v37 = vpack.c.bf16 %v639_v32, %v638_v31 }
 0x233   :  { %v1079_v38 = vpop.f32.mrb[23].mxu1 }
 0x234   :  { %v608_v49 = vadd.f32 %v1077_v35, %v1450_v41  ;;  %v1080_v50 = vadd.f32 %v1079_v38, %v1078_v36  ;;  %1133 = vmatprep.mubr.bf16.mxu1 %v650_v37 }
 0x236   :  { %v611_v39 = vadd.f32 %v1080_v50, %v1450_v41  ;;  %v640_v40 = vmax.f32 %v608_v49, 0.0 }
 0x238   :  { %v641_v42 = vmax.f32 %v611_v39, 0.0  ;;  %v1081_v43 = vpop.f32.mrb[24].mxu1 }
 0x239   :  { %v1082_v44 = vpop.f32.mrb[25].mxu1 }
 0x23a   :  { %v651_v45 = vpack.c.bf16 %v641_v42, %v640_v40  ;;  %v1083_v46 = vadd.f32 %v1082_v44, %v1081_v43  ;;  %v1084_v47 = vpop.f32.mrb[26].mxu1 }
 0x23b   :  { %v1085_v48 = vpop.f32.mrb[27].mxu1 }
 0x23c   :  { %v616_v51 = vadd.f32 %v1083_v46, %v1450_v41  ;;  %v1086_v52 = vadd.f32 %v1085_v48, %v1084_v47  ;;  %1134 = vmatmul.mubr.bf16.vlgmr.msra.gmra.mrb[32].mxu1 %v651_v45 }
 0x23e   :  { %v619_v53 = vadd.f32 %v1086_v52, %v1450_v41  ;;  %v642_v54 = vmax.f32 %v616_v51, 0.0 }
 0x240   :  { %v643_v55 = vmax.f32 %v619_v53, 0.0  ;;  %v1087_v56 = vpop.f32.mrb[28].mxu1 }
 0x241   :  { %v1088_v57 = vpop.f32.mrb[29].mxu1 }
 0x242   :  { %v1089_v58 = vadd.f32 %v1088_v57, %v1087_v56  ;;  %v1090_v59 = vpop.f32.mrb[30].mxu1  ;;  %v652_v60 = vpack.c.bf16 %v643_v55, %v642_v54 }
 0x243   :  { %v1091_v61 = vpop.f32.mrb[31].mxu1 }
 0x244   :  { %v624_v62 = vadd.f32 %v1089_v58, %v1450_v41  ;;  %v1092_v63 = vadd.f32 %v1091_v61, %v1090_v59  ;;  %1137 = vmatprep.mubr.bf16.mxu1 %v652_v60 }
 0x246   :  { %v627_v0 = vadd.f32 %v1092_v63, %v1450_v41  ;;  %v644_v1 = vmax.f32 %v624_v62, 0.0 }
 0x248   :  { %v645_v2 = vmax.f32 %v627_v0, 0.0 }
 0x24a   :  { %v653_v3 = vpack.c.bf16 %v645_v2, %v644_v1 }
 0x24c   :  { %1138 = vmatmul.mubr.bf16.gmra.mrb[36].mxu1 %v653_v3 }
 0x2ef   :  { %v1127_v4 = vpop.f32.mrb[32].mxu0 }
 0x2f0   :  { %v752_v5 = vpop.f32.mrb[33].mxu0 }
 0x2f1   :  { %v1128_v6 = vpop.f32.mrb[34].mxu0 }
 0x2f2   :  { %v990_v7 = vpack.c.bf16 %v1128_v6, %v1127_v4  ;;  %v755_v8 = vpop.f32.mrb[35].mxu0 }
 0x2f3   :  { %v985_v9 = vpack.c.bf16 %v755_v8, %v752_v5 }
 0x2f4   :  { %1022 = vst [vmem:[%s1498_s6 + $0x8] sm:$0xff] %v990_v7  }
 0x2f5   :  { %986 = vst [vmem:[%s1498_s6] sm:$0xff] %v985_v9  }
 0x2ff   :  { %v1131_v10 = vpop.f32.mrb[36].mxu0 }
 0x300   :  { %v768_v41 = vpop.f32.mrb[37].mxu0 }
 0x301   :  { %v1132_v11 = vpop.f32.mrb[38].mxu0 }
 0x302   :  { %v1000_v12 = vpack.c.bf16 %v1132_v11, %v1131_v10  ;;  %v771_v13 = vpop.f32.mrb[39].mxu0 }
 0x303   :  { %v995_v14 = vpack.c.bf16 %v771_v13, %v768_v41 }
 0x304   :  { %1024 = vst [vmem:[%s1498_s6 + $0x18] sm:$0xff] %v1000_v12  }
 0x305   :  { %1023 = vst [vmem:[%s1498_s6 + $0x10] sm:$0xff] %v995_v14  }
 0x30f   :  { %v1135_v15 = vpop.f32.mrb[32].mxu1 }
 0x310   :  { %v784_v16 = vpop.f32.mrb[33].mxu1 }
 0x311   :  { %v1136_v17 = vpop.f32.mrb[34].mxu1 }
 0x312   :  { %v1010_v18 = vpack.c.bf16 %v1136_v17, %v1135_v15  ;;  %v787_v19 = vpop.f32.mrb[35].mxu1 }
 0x313   :  { %v1005_v20 = vpack.c.bf16 %v787_v19, %v784_v16 }
 0x314   :  { %1026 = vst [vmem:[%s1498_s6 + $0x28] sm:$0xff] %v1010_v18  }
 0x315   :  { %1025 = vst [vmem:[%s1498_s6 + $0x20] sm:$0xff] %v1005_v20  }
 0x31f   :  { %v1139_v21 = vpop.f32.mrb[36].mxu1 }
 0x320   :  { %v800_v22 = vpop.f32.mrb[37].mxu1 }
 0x321   :  { %v1140_v23 = vpop.f32.mrb[38].mxu1 }
 0x322   :  { %v1020_v24 = vpack.c.bf16 %v1140_v23, %v1139_v21  ;;  %v803_v25 = vpop.f32.mrb[39].mxu1 }
 0x323   :  { %v1015_v26 = vpack.c.bf16 %v803_v25, %v800_v22 }
 0x324   :  { %1028 = vst [vmem:[%s1498_s6 + $0x38] sm:$0xff] %v1020_v24  }
 0x325   :  { %1027 = vst [vmem:[%s1498_s6 + $0x30] sm:$0xff] %v1015_v26  }
 0x326   :  { %899 = vsyncpa [#allocation3], 1 }
 0x327   :  { %900 = vsyncpa [#allocation5], 1 }

// kernel: roland_lp_forward.7
= control target key start
LH: loop header
LB: loop body
LE: loop exit
PB: predicated region body
PF: predicated region fallthrough
CT: control target
= control target key end

     0   :  { %vm139_vm0 = vcmask 7168   ;;  %s370_s0 = inlined_call_operand.vmem [shape: f32[128,128], index: 0, kind: input, shape index: {}]   ;;  %s371_s1 = inlined_call_operand.vmem [shape: f32[128,128], index: 1, kind: input, shape index: {}]   ;;  %s372_s2 = inlined_call_operand.vmem [shape: f32[1,128], index: 2, kind: input, shape index: {}]   ;;  %s373_s3 = inlined_call_operand.<no memory space> [shape: f32[1], index: 3, kind: input, shape index: {}]   ;;  %s374_s4 = inlined_call_operand.vmem [shape: f32[128,1], index: 4, kind: output, shape index: {}]  }
   0x1   :  { %v20_v0 = vld [vmem:[%s370_s0 + $0x10] sm:$0xff]  ;;  %v195_v2 = vld [vmem:[%s372_s2] ss:$0 sm:$0xff]  ;;  %v21_v6 = vld [vmem:[%s370_s0 + $0x18] sm:$0xff] }
   0x2   :  { %v36_v1 = vld [vmem:[%s371_s1 + $0x10] sm:$0xff]  ;;  %v18_v4 = vld [vmem:[%s370_s0] sm:$0xff]  ;;  %v37_v8 = vld [vmem:[%s371_s1 + $0x18] sm:$0xff] }
   0x3   :  { %v52_v3 = vmul.f32 %v36_v1, %v20_v0  ;;  %v34_v5 = vld [vmem:[%s371_s1] sm:$0xff]  ;;  %v19_v9 = vld [vmem:[%s370_s0 + $0x8] sm:$0xff]  ;;  %v53_v12 = vmul.f32 %v37_v8, %v21_v6  ;;  %v25_v23 = vld [vmem:[%s370_s0 + $0x38] sm:$0xff]  ;;  %v122_v1 = vstv %s373_s3 }
   0x4   :  { %v50_v7 = vmul.f32 %v34_v5, %v18_v4  ;;  %v35_v10 = vld [vmem:[%s371_s1 + $0x8] sm:$0xff]  ;;  %v22_v16 = vld [vmem:[%s370_s0 + $0x20] sm:$0xff]  ;;  %v41_v24 = vld [vmem:[%s371_s1 + $0x38] sm:$0xff] }
   0x5   :  { %v75_v11 = vmul.f32 %v195_v2, %v52_v3  ;;  %v51_v13 = vmul.f32 %v35_v10, %v19_v9  ;;  %v23_v14 = vld [vmem:[%s370_s0 + $0x28] sm:$0xff]  ;;  %v38_v18 = vld [vmem:[%s371_s1 + $0x20] sm:$0xff]  ;;  %v76_v19 = vmul.f32 %v195_v2, %v53_v12  ;;  %v24_v25 = vld [vmem:[%s370_s0 + $0x30] sm:$0xff]  ;;  %v57_v28 = vmul.f32 %v41_v24, %v25_v23 }
   0x6   :  { %v39_v15 = vld [vmem:[%s371_s1 + $0x28] sm:$0xff]  ;;  %v73_v17 = vmul.f32 %v195_v2, %v50_v7  ;;  %v54_v22 = vmul.f32 %v38_v18, %v22_v16  ;;  %v40_v26 = vld [vmem:[%s371_s1 + $0x30] sm:$0xff]  ;;  %v26_v33 = vld [vmem:[%s370_s0 + $0x40] sm:$0xff] }
   0x7   :  { %93 = vadd.xlane.f32.xlu1 %v75_v11  ;;  %v55_v20 = vmul.f32 %v39_v15, %v23_v14  ;;  %v74_v21 = vmul.f32 %v195_v2, %v51_v13  ;;  %v56_v30 = vmul.f32 %v40_v26, %v24_v25  ;;  %v27_v31 = vld [vmem:[%s370_s0 + $0x48] sm:$0xff]  ;;  %v42_v34 = vld [vmem:[%s371_s1 + $0x40] sm:$0xff]  ;;  %v80_v35 = vmul.f32 %v195_v2, %v57_v28  ;;  %v29_v39 = vld [vmem:[%s370_s0 + $0x58] sm:$0xff] }
   0x8   :  { %89 = vadd.xlane.f32.xlu0 %v73_v17  ;;  %v77_v29 = vmul.f32 %v195_v2, %v54_v22  ;;  %v43_v32 = vld [vmem:[%s371_s1 + $0x48] sm:$0xff]  ;;  %v58_v38 = vmul.f32 %v42_v34, %v26_v33  ;;  %v45_v40 = vld [vmem:[%s371_s1 + $0x58] sm:$0xff]  ;;  %v28_v41 = vld [vmem:[%s370_s0 + $0x50] sm:$0xff] }
   0x9   :  { %v78_v27 = vmul.f32 %v195_v2, %v55_v20  ;;  %v59_v36 = vmul.f32 %v43_v32, %v27_v31  ;;  %v79_v37 = vmul.f32 %v195_v2, %v56_v30  ;;  %v44_v42 = vld [vmem:[%s371_s1 + $0x50] sm:$0xff]  ;;  %v61_v44 = vmul.f32 %v45_v40, %v29_v39  ;;  %v31_v47 = vld [vmem:[%s370_s0 + $0x68] sm:$0xff]  ;;  %v30_v49 = vld [vmem:[%s370_s0 + $0x60] sm:$0xff] }
   0xa   :  { %v81_v45 = vmul.f32 %v195_v2, %v58_v38  ;;  %v60_v46 = vmul.f32 %v44_v42, %v28_v41  ;;  %v47_v48 = vld [vmem:[%s371_s1 + $0x68] sm:$0xff]  ;;  %v46_v50 = vld [vmem:[%s371_s1 + $0x60] sm:$0xff]  ;;  %v33_v55 = vld [vmem:[%s370_s0 + $0x78] sm:$0xff] }
   0xb   :  { %95 = vadd.xlane.f32.xlu1 %v76_v19  ;;  %v82_v43 = vmul.f32 %v195_v2, %v59_v36  ;;  %v84_v51 = vmul.f32 %v195_v2, %v61_v44  ;;  %v63_v52 = vmul.f32 %v47_v48, %v31_v47  ;;  %v62_v54 = vmul.f32 %v46_v50, %v30_v49  ;;  %v49_v56 = vld [vmem:[%s371_s1 + $0x78] sm:$0xff]  ;;  %v32_v57 = vld [vmem:[%s370_s0 + $0x70] sm:$0xff] }
   0xc   :  { %91 = vadd.xlane.f32.xlu0 %v74_v21  ;;  %v83_v53 = vmul.f32 %v195_v2, %v60_v46  ;;  %v48_v58 = vld [vmem:[%s371_s1 + $0x70] sm:$0xff]  ;;  %v65_v60 = vmul.f32 %v49_v56, %v33_v55 }
   0xd   :  { %v86_v59 = vmul.f32 %v195_v2, %v63_v52  ;;  %v85_v61 = vmul.f32 %v195_v2, %v62_v54  ;;  %v64_v62 = vmul.f32 %v48_v58, %v32_v57 }
   0xe   :  { %v88_v63 = vmul.f32 %v195_v2, %v65_v60 }
   0xf   :  { %99 = vadd.xlane.f32.xlu1 %v78_v27  ;;  %v87_v0 = vmul.f32 %v195_v2, %v64_v62 }
  0x10   :  { %97 = vadd.xlane.f32.xlu0 %v77_v29 }
  0x13   :  { %103 = vadd.xlane.f32.xlu1 %v80_v35 }
  0x14   :  { %101 = vadd.xlane.f32.xlu0 %v79_v37 }
  0x17   :  { %107 = vadd.xlane.f32.xlu1 %v82_v43 }
  0x18   :  { %105 = vadd.xlane.f32.xlu0 %v81_v45 }
  0x1b   :  { %111 = vadd.xlane.f32.xlu1 %v84_v51 }
  0x1c   :  { %109 = vadd.xlane.f32.xlu0 %v83_v53 }
  0x1f   :  { %115 = vadd.xlane.f32.xlu1 %v86_v59 }
  0x20   :  { %113 = vadd.xlane.f32.xlu0 %v85_v61 }
  0x23   :  { %119 = vadd.xlane.f32.xlu1 %v88_v63 }
  0x24   :  { %117 = vadd.xlane.f32.xlu0 %v87_v0 }
  0x94   :  { %v94_v3 = vpop.xlane.xlu1 %93 }
  0x95   :  { %v125_v4 = vadd.f32 %v122_v1, %v94_v3  ;;  %v90_v5 = vpop.xlane.xlu0 %89 }
  0x96   :  { %v123_v6 = vadd.f32 %v122_v1, %v90_v5 }
  0x97   :  { %142 = vst.msk [vmem:[%s374_s4 + $0x10] sm:$0xff] %vm139_vm0, %v125_v4 }
  0x98   :  { %140 = vst.msk [vmem:[%s374_s4] sm:$0xff] %vm139_vm0, %v123_v6  ;;  %v96_v2 = vpop.xlane.xlu1 %95 }
  0x99   :  { %v126_v7 = vadd.f32 %v122_v1, %v96_v2  ;;  %v92_v8 = vpop.xlane.xlu0 %91 }
  0x9a   :  { %v124_v9 = vadd.f32 %v122_v1, %v92_v8 }
  0x9b   :  { %143 = vst.msk [vmem:[%s374_s4 + $0x18] sm:$0xff] %vm139_vm0, %v126_v7 }
  0x9c   :  { %141 = vst.msk [vmem:[%s374_s4 + $0x8] sm:$0xff] %vm139_vm0, %v124_v9  ;;  %v100_v10 = vpop.xlane.xlu1 %99 }
  0x9d   :  { %v128_v11 = vadd.f32 %v122_v1, %v100_v10  ;;  %v98_v12 = vpop.xlane.xlu0 %97 }
  0x9e   :  { %v127_v13 = vadd.f32 %v122_v1, %v98_v12 }
  0x9f   :  { %145 = vst.msk [vmem:[%s374_s4 + $0x28] sm:$0xff] %vm139_vm0, %v128_v11 }
  0xa0   :  { %144 = vst.msk [vmem:[%s374_s4 + $0x20] sm:$0xff] %vm139_vm0, %v127_v13  ;;  %v104_v14 = vpop.xlane.xlu1 %103 }
  0xa1   :  { %v130_v15 = vadd.f32 %v122_v1, %v104_v14  ;;  %v102_v16 = vpop.xlane.xlu0 %101 }
  0xa2   :  { %v129_v17 = vadd.f32 %v122_v1, %v102_v16 }
  0xa3   :  { %147 = vst.msk [vmem:[%s374_s4 + $0x38] sm:$0xff] %vm139_vm0, %v130_v15 }
  0xa4   :  { %146 = vst.msk [vmem:[%s374_s4 + $0x30] sm:$0xff] %vm139_vm0, %v129_v17  ;;  %v108_v18 = vpop.xlane.xlu1 %107 }
  0xa5   :  { %v132_v19 = vadd.f32 %v122_v1, %v108_v18  ;;  %v106_v20 = vpop.xlane.xlu0 %105 }
  0xa6   :  { %v131_v21 = vadd.f32 %v122_v1, %v106_v20 }
  0xa7   :  { %149 = vst.msk [vmem:[%s374_s4 + $0x48] sm:$0xff] %vm139_vm0, %v132_v19 }
  0xa8   :  { %148 = vst.msk [vmem:[%s374_s4 + $0x40] sm:$0xff] %vm139_vm0, %v131_v21  ;;  %v112_v22 = vpop.xlane.xlu1 %111 }
  0xa9   :  { %v134_v23 = vadd.f32 %v122_v1, %v112_v22  ;;  %v110_v24 = vpop.xlane.xlu0 %109 }
  0xaa   :  { %v133_v25 = vadd.f32 %v122_v1, %v110_v24 }
  0xab   :  { %151 = vst.msk [vmem:[%s374_s4 + $0x58] sm:$0xff] %vm139_vm0, %v134_v23 }
  0xac   :  { %150 = vst.msk [vmem:[%s374_s4 + $0x50] sm:$0xff] %vm139_vm0, %v133_v25  ;;  %v116_v26 = vpop.xlane.xlu1 %115 }
  0xad   :  { %v136_v27 = vadd.f32 %v122_v1, %v116_v26  ;;  %v114_v28 = vpop.xlane.xlu0 %113 }
  0xae   :  { %v135_v29 = vadd.f32 %v122_v1, %v114_v28 }
  0xaf   :  { %153 = vst.msk [vmem:[%s374_s4 + $0x68] sm:$0xff] %vm139_vm0, %v136_v27 }
  0xb0   :  { %152 = vst.msk [vmem:[%s374_s4 + $0x60] sm:$0xff] %vm139_vm0, %v135_v29  ;;  %v120_v30 = vpop.xlane.xlu1 %119 }
  0xb1   :  { %v138_v31 = vadd.f32 %v122_v1, %v120_v30  ;;  %v118_v32 = vpop.xlane.xlu0 %117 }
  0xb2   :  { %v137_v33 = vadd.f32 %v122_v1, %v118_v32 }
  0xb3   :  { %155 = vst.msk [vmem:[%s374_s4 + $0x78] sm:$0xff] %vm139_vm0, %v138_v31 }
  0xb4   :  { %154 = vst.msk [vmem:[%s374_s4 + $0x70] sm:$0xff] %vm139_vm0, %v137_v33 }

</bundles_post_ra>
